<compile_context>
chip_gen: v5e
topology: v5e:2x2
jax: 0.10.0
libtpu: 0.0.40
codegen_flags: <defaults>
</compile_context>

<pallas_src>
import functools

import jax
import jax.numpy as jnp
import numpy as np
from jax.experimental import pallas as pl
from jax.experimental.pallas import tpu as pltpu

EPS = 1e-5


# ---------------------------------------------------------------------------
# In-kernel helpers (2-D (channels, lanes) values only -> safe Mosaic lowering)
# ---------------------------------------------------------------------------
def _silu(v):
    # exp lands on the EUP (VPU slots stay free); exact reciprocal keeps f32
    # accuracy vs the reference (approx=True is a further v5e-only option).
    return v * pl.reciprocal(1.0 + jnp.exp(-v), approx=False)


def _dw_conv_s1(x, w_taps, row_mask, col_mask, k, W):
    """Depthwise k x k conv, stride 1, zero padding k//2, lane-packed images.

    x:        (C, L) f32, L = Nb*H*W; lane n*H*W + h*W + w is pixel (h, w) of
              packed image n.
    w_taps:   (C, k*k) f32, tap (kh, kw) at column kh*k + kw (BN scale folded).
    row_mask: (2P+1, L) f32, row P+dh = 1 where source row h+dh is in [0, H).
    col_mask: (2P+1, L) f32, row P+dw = 1 where source col w+dw is in [0, W).
    The masks zero every contribution that crosses an image border, so the
    circular pltpu.roll never leaks data between packed images.
    """
    L = x.shape[1]
    p = k // 2
    P = row_mask.shape[0] // 2

    # k row-shifted (XLU roll) + row-masked copies of x.
    rows = []
    for kh in range(k):
        dh = kh - p
        if dh == 0:
            rows.append(x)
        else:
            r = pltpu.roll(x, shift=(-dh * W) % L, axis=1)
            rows.append(r * row_mask[P + dh:P + dh + 1, :])

    # Per horizontal offset dw: weighted sum over dh, then ONE col roll + mask.
    acc = None
    for kw in range(k):
        dw = kw - p
        s = rows[0] * w_taps[:, kw:kw + 1]
        for kh in range(1, k):
            c = kh * k + kw
            s = s + rows[kh] * w_taps[:, c:c + 1]
        if dw != 0:
            s = pltpu.roll(s, shift=(-dw) % L, axis=1)
            s = s * col_mask[P + dw:P + dw + 1, :]
        acc = s if acc is None else acc + s
    return acc


# ---------------------------------------------------------------------------
# Fused GhostBottleneck kernel: one grid step == Nb lane-packed images
# ---------------------------------------------------------------------------
def _ghost_bottleneck_kernel(*refs, c2, k, stride, W, Wo):
    c_half = c2 // 2                    # hidden channels of the Ghost module
    cg = c_half // 2                    # "primary" channels inside GhostConv1

    if stride == 2:
        (x_ref, wa_ref, ba_ref, wb_ref, bb_ref, wd_ref, bd_ref, we_ref, be_ref,
         rmf_ref, cmf_ref, wdw_ref, bdw_ref, wsd_ref, bsd_ref, wsp_ref,
         bsp_ref, sel_ref, rmh_ref, cmh_ref, o_ref) = refs
    else:
        (x_ref, wa_ref, ba_ref, wb_ref, bb_ref, wd_ref, bd_ref, we_ref, be_ref,
         rmf_ref, cmf_ref, o_ref) = refs

    x = x_ref[...].astype(jnp.float32)              # (c1, Nb*H*W)
    rmf = rmf_ref[...]
    cmf = cmf_ref[...]

    # ---- GhostConv(c1, c_half, 1, 1, act=True) ----------------------------
    a = jnp.dot(wa_ref[...], x.astype(jnp.bfloat16),
                preferred_element_type=jnp.float32) + ba_ref[...]
    a = _silu(a)                                                        # cv1
    b = _silu(_dw_conv_s1(a, wb_ref[...], rmf, cmf, 5, W) + bb_ref[...])  # cv2
    # GhostConv1 output = cat([a, b], channel); kept as two row blocks.

    # ---- optional DWConv(c_half, c_half, k, 2, act=False) -----------------
    if stride == 2:
        wdw = wdw_ref[...]
        dwa = _dw_conv_s1(a, wdw[:cg], rmf, cmf, k, W)
        dwb = _dw_conv_s1(b, wdw[cg:], rmf, cmf, k, W)
        dwx = _dw_conv_s1(x, wsd_ref[...], rmf, cmf, k, W)  # shortcut DWConv
        # ONE bf16 stride-2 selection matmul for all three row blocks.
        stacked = jnp.concatenate([dwa, dwb, dwx], axis=0).astype(jnp.bfloat16)
        sub = jnp.dot(stacked, sel_ref[...],
                      preferred_element_type=jnp.float32)
        bdw = bdw_ref[...]
        ya = sub[:cg] + bdw[:cg]
        yb = sub[cg:c_half] + bdw[cg:]
        t = sub[c_half:] + bsd_ref[...]
        sc = jnp.dot(wsp_ref[...], t.astype(jnp.bfloat16),
                     preferred_element_type=jnp.float32) + bsp_ref[...]
        rm2, cm2, W2 = rmh_ref[...], cmh_ref[...], Wo
    else:
        ya, yb = a, b
        sc = x                                      # identity (c1 == c2)
        rm2, cm2, W2 = rmf, cmf, W

    # ---- GhostConv(c_half, c2, 1, 1, act=False) ---------------------------
    wd = wd_ref[...]
    d = (jnp.dot(wd[:, :cg], ya.astype(jnp.bfloat16),
                 preferred_element_type=jnp.float32)
         + jnp.dot(wd[:, cg:], yb.astype(jnp.bfloat16),
                   preferred_element_type=jnp.float32)
         + bd_ref[...])                                                 # cv1
    e = _dw_conv_s1(d, we_ref[...], rm2, cm2, 5, W2) + be_ref[...]      # cv2

    # ---- residual add; halves stored straight into the output block -------
    o_ref[:c_half, :] = (d + sc[:c_half]).astype(o_ref.dtype)
    o_ref[c_half:, :] = (e + sc[c_half:]).astype(o_ref.dtype)


# ---------------------------------------------------------------------------
# Host-side constants / specs
# ---------------------------------------------------------------------------
def _dw_masks(H, W, Nb, P):
    """Per-offset validity masks for lane-packed images -> (2P+1, Nb*H*W)."""
    hw = H * W
    rr = np.arange(hw) // W
    cc = np.arange(hw) % W
    rm = np.stack([((rr + d >= 0) & (rr + d < H)) for d in range(-P, P + 1)])
    cm = np.stack([((cc + d >= 0) & (cc + d < W)) for d in range(-P, P + 1)])
    rm = np.tile(rm.astype(np.float32), (1, Nb))
    cm = np.tile(cm.astype(np.float32), (1, Nb))
    return jnp.asarray(rm), jnp.asarray(cm)


def _subsample_matrix(H, W, Nb):
    """Block-diagonal 0/1 stride-2 selection: (Nb*H*W, Nb*Ho*Wo), bf16-exact."""
    Ho, Wo = H // 2, W // 2
    hw, hwo = H * W, Ho * Wo
    S = np.zeros((Nb * hw, Nb * hwo), np.float32)
    for n in range(Nb):
        for i in range(Ho):
            for j in range(Wo):
                S[n * hw + 2 * i * W + 2 * j, n * hwo + i * Wo + j] = 1.0
    return jnp.asarray(S, dtype=jnp.bfloat16)


def _const_spec(shape):
    ndim = len(shape)
    # Constant index_map -> Pallas keeps the block resident (no per-step DMA).
    return pl.BlockSpec(shape, lambda n: (0,) * ndim)


def _pick_batch_block(N, HW, HWo):
    """Images packed per grid step: lane-dense blocks, >=2 grid steps if possible."""
    def ok(nb):
        return N % nb == 0 and (
            nb == N or ((nb * HW) % 128 == 0 and (nb * HWo) % 128 == 0))
    cands = [nb for nb in range(1, N + 1) if ok(nb)]
    # Prefer >=2 steps (v7x dual-TC) with the most packing at a modest lane
    # width (keeps f32 intermediates well inside VMEM, incl. v7x's 64 MiB).
    multi = [nb for nb in cands if N // nb >= 2 and nb * HW <= 4096]
    return max(multi) if multi else min(cands)


# ---------------------------------------------------------------------------
# Public forward (NCHW in / NCHW out, like the PyTorch module)
# ---------------------------------------------------------------------------
def ghost_bottleneck_forward(x_nchw, params, *, k, s, batch_block=None):
    assert s in (1, 2)
    N, c1, H, W = x_nchw.shape
    c2 = 2 * params["wd"].shape[0]
    assert c2 % 4 == 0
    if s == 1:
        assert c1 == c2, "identity shortcut requires c1 == c2"
    else:
        assert H % 2 == 0 and W % 2 == 0, "stride-2 path assumes even H, W"
    HW = H * W
    Ho, Wo = H // s, W // s
    HWo = Ho * Wo

    Nb = batch_block or _pick_batch_block(N, HW, HWo)
    assert N % Nb == 0
    L_in, L_out = Nb * HW, Nb * HWo

    # Channel-major slab with the batch packed along lanes (wrapper-side
    # layout plumbing; every kernel load/store sees >=128 dense lanes).
    x_cm = jnp.transpose(x_nchw.reshape(N, c1, HW), (1, 0, 2)).reshape(c1, N * HW)

    rm_f, cm_f = _dw_masks(H, W, Nb, max(2, k // 2))
    inputs = [x_cm, params["wa"], params["ba"], params["wb"], params["bb"],
              params["wd"], params["bd"], params["we"], params["be"],
              rm_f, cm_f]
    in_specs = [pl.BlockSpec((c1, L_in), lambda n: (0, n))]
    in_specs += [_const_spec(a.shape) for a in inputs[1:]]

    if s == 2:
        rm_h, cm_h = _dw_masks(Ho, Wo, Nb, 2)
        extra = [params["wdw"], params["bdw"], params["wsd"], params["bsd"],
                 params["wsp"], params["bsp"],
                 _subsample_matrix(H, W, Nb), rm_h, cm_h]
        inputs += extra
        in_specs += [_const_spec(a.shape) for a in extra]

    out_cm = pl.pallas_call(
        functools.partial(_ghost_bottleneck_kernel,
                          c2=c2, k=k, stride=s, W=W, Wo=Wo),
        out_shape=jax.ShapeDtypeStruct((c2, N * HWo), jnp.float32),
        grid=(N // Nb,),
        in_specs=in_specs,
        out_specs=pl.BlockSpec((c2, L_out), lambda n: (0, n)),
        compiler_params=pltpu.CompilerParams(
            dimension_semantics=("parallel",)),     # v7x: shard steps over TCs
    )(*inputs)

    out = jnp.transpose(out_cm.reshape(c2, N, HWo), (1, 0, 2))
    return out.reshape(N, c2, Ho, Wo)


# ---------------------------------------------------------------------------
# Deterministic synthetic parameters (BatchNorm folded, inference mode)
# ---------------------------------------------------------------------------
def make_params(key, c1, c2, k, s):
    assert c2 % 4 == 0
    c_half = c2 // 2
    cg = c_half // 2
    keys = iter(jax.random.split(key, 64))

    def u(shape, scale=0.3):
        return jax.random.uniform(next(keys), shape, jnp.float32, -1.0, 1.0) * scale

    def bn_fold(c):
        gamma = 1.0 + u((c,), 0.1)
        beta = u((c,), 0.1)
        mean = u((c,), 0.1)
        var = 1.0 + u((c,), 0.1)
        scale = gamma / jnp.sqrt(var + EPS)
        return scale, beta - mean * scale

    def conv1x1(cout, cin):                 # Conv2d(cin, cout, 1, bias=False)+BN
        w = u((cout, cin))
        scale, bias = bn_fold(cout)
        # bf16 weights: native MXU operand dtype (kernel and reference share
        # the exact same rounded values, so only activation casts differ).
        return (w * scale[:, None]).astype(jnp.bfloat16), bias[:, None]

    def dwconv(c, kk):                      # Conv2d(c, c, kk, groups=c)+BN
        w = u((c, kk * kk))
        scale, bias = bn_fold(c)
        return w * scale[:, None], bias[:, None]

    p = {}
    p["wa"], p["ba"] = conv1x1(cg, c1)          # GhostConv1.cv1
    p["wb"], p["bb"] = dwconv(cg, 5)            # GhostConv1.cv2 (5x5 DW)
    p["wd"], p["bd"] = conv1x1(c_half, c_half)  # GhostConv2.cv1
    p["we"], p["be"] = dwconv(c_half, 5)        # GhostConv2.cv2 (5x5 DW)
    if s == 2:
        p["wdw"], p["bdw"] = dwconv(c_half, k)  # middle DWConv, stride 2
        p["wsd"], p["bsd"] = dwconv(c1, k)      # shortcut DWConv, stride 2
        p["wsp"], p["bsp"] = conv1x1(c2, c1)    # shortcut 1x1 Conv
    return p


# ---------------------------------------------------------------------------
# Pure-JAX (XLA) f32 reference with the same folded parameters
# ---------------------------------------------------------------------------
def _reference_forward(x, p, k, s):
    hi = jax.lax.Precision.HIGHEST

    def conv1x1(v, w, b):
        return (jnp.einsum("oc,nchw->nohw", w.astype(jnp.float32), v,
                           precision=hi) + b[None, :, :, None])

    def dwconv(v, w, b, kk, stride):
        C = v.shape[1]
        y = jax.lax.conv_general_dilated(
            v, w.reshape(C, 1, kk, kk).astype(jnp.float32),
            window_strides=(stride, stride),
            padding=((kk // 2, kk // 2), (kk // 2, kk // 2)),
            dimension_numbers=("NCHW", "OIHW", "NCHW"),
            feature_group_count=C, precision=hi)
        return y + b[None, :, :, None]

    def silu(v):
        return v * jax.nn.sigmoid(v)

    a = silu(conv1x1(x, p["wa"], p["ba"]))
    b = silu(dwconv(a, p["wb"], p["bb"], 5, 1))
    y = jnp.concatenate([a, b], axis=1)
    if s == 2:
        y = dwconv(y, p["wdw"], p["bdw"], k, 2)
    d = conv1x1(y, p["wd"], p["bd"])
    e = dwconv(d, p["we"], p["be"], 5, 1)
    conv_out = jnp.concatenate([d, e], axis=1)
    if s == 2:
        sc = conv1x1(dwconv(x, p["wsd"], p["bsd"], k, 2), p["wsp"], p["bsp"])
    else:
        sc = x
    return conv_out + sc


def _check(y, r, tag):
    # bf16 MXU operands in the kernel vs f32 reference -> relative-style check.
    err = float(jnp.max(jnp.abs(y - r)))
    tol = 3e-2 * max(1.0, float(jnp.max(jnp.abs(r))))
    assert err < tol, (tag, err, tol)


if __name__ == "__main__":
    key = jax.random.PRNGKey(0)
    kx, kp1, kp2 = jax.random.split(key, 3)
    N, H, W = 4, 16, 16          # N=4 -> 2 grid steps with Nb=2 batch blocking

    x = jax.random.normal(kx, (N, 16, H, W), jnp.float32)

    # GhostBottleneck(c1=16, c2=16, k=3, s=1): identity shortcut
    p1 = make_params(kp1, 16, 16, k=3, s=1)
    y1 = jax.block_until_ready(ghost_bottleneck_forward(x, p1, k=3, s=1))
    assert y1.shape == (N, 16, H, W), y1.shape
    _check(y1, _reference_forward(x, p1, 3, 1), "s1")

    # GhostBottleneck(c1=16, c2=32, k=3, s=2): DWConv + 1x1 Conv shortcut
    p2 = make_params(kp2, 16, 32, k=3, s=2)
    y2 = jax.block_until_ready(ghost_bottleneck_forward(x, p2, k=3, s=2))
    assert y2.shape == (N, 32, H // 2, W // 2), y2.shape
    _check(y2, _reference_forward(x, p2, 3, 2), "s2")

    print("KERNEL_OK")
</pallas_src>

<mosaic_0001>
module attributes {stable_mosaic.version = 11 : i64} {
  func.func @_ghost_bottleneck_kernel(%arg0: i32, %arg1: memref<16x512xf32, #tpu.memory_space<vmem>>, %arg2: memref<4x16xbf16, #tpu.memory_space<vmem>>, %arg3: memref<4x1xf32, #tpu.memory_space<vmem>>, %arg4: memref<4x25xf32, #tpu.memory_space<vmem>>, %arg5: memref<4x1xf32, #tpu.memory_space<vmem>>, %arg6: memref<8x8xbf16, #tpu.memory_space<vmem>>, %arg7: memref<8x1xf32, #tpu.memory_space<vmem>>, %arg8: memref<8x25xf32, #tpu.memory_space<vmem>>, %arg9: memref<8x1xf32, #tpu.memory_space<vmem>>, %arg10: memref<5x512xf32, #tpu.memory_space<vmem>>, %arg11: memref<5x512xf32, #tpu.memory_space<vmem>>, %arg12: memref<16x512xf32, #tpu.memory_space<vmem>>) attributes {dimension_semantics = [#tpu.dimension_semantics<parallel>], iteration_bounds = array<i64: 2>, scalar_prefetch = 0 : i64, scratch_operands = 0 : i64, tpu.core_type = #tpu.core_type<tc>, window_params = [{transform_indices = @transform_0, window_bounds = array<i64: 16, 512>}, {pipeline_mode = #tpu.pipeline_mode<synchronous>, transform_indices = @transform_1, window_bounds = array<i64: 4, 16>}, {pipeline_mode = #tpu.pipeline_mode<synchronous>, transform_indices = @transform_2, window_bounds = array<i64: 4, 1>}, {pipeline_mode = #tpu.pipeline_mode<synchronous>, transform_indices = @transform_3, window_bounds = array<i64: 4, 25>}, {pipeline_mode = #tpu.pipeline_mode<synchronous>, transform_indices = @transform_4, window_bounds = array<i64: 4, 1>}, {pipeline_mode = #tpu.pipeline_mode<synchronous>, transform_indices = @transform_5, window_bounds = array<i64: 8, 8>}, {pipeline_mode = #tpu.pipeline_mode<synchronous>, transform_indices = @transform_6, window_bounds = array<i64: 8, 1>}, {pipeline_mode = #tpu.pipeline_mode<synchronous>, transform_indices = @transform_7, window_bounds = array<i64: 8, 25>}, {pipeline_mode = #tpu.pipeline_mode<synchronous>, transform_indices = @transform_8, window_bounds = array<i64: 8, 1>}, {pipeline_mode = #tpu.pipeline_mode<synchronous>, transform_indices = @transform_9, window_bounds = array<i64: 5, 512>}, {pipeline_mode = #tpu.pipeline_mode<synchronous>, transform_indices = @transform_10, window_bounds = array<i64: 5, 512>}, {transform_indices = @transform_11, window_bounds = array<i64: 16, 512>}]} {
    %c0 = arith.constant 0 : index
    %c0_0 = arith.constant 0 : index
    %0 = vector.load %arg1[%c0, %c0_0] : memref<16x512xf32, #tpu.memory_space<vmem>>, vector<16x512xf32>
    %c0_1 = arith.constant 0 : index
    %c0_2 = arith.constant 0 : index
    %1 = vector.load %arg10[%c0_1, %c0_2] : memref<5x512xf32, #tpu.memory_space<vmem>>, vector<5x512xf32>
    %c0_3 = arith.constant 0 : index
    %c0_4 = arith.constant 0 : index
    %2 = vector.load %arg11[%c0_3, %c0_4] : memref<5x512xf32, #tpu.memory_space<vmem>>, vector<5x512xf32>
    %c0_5 = arith.constant 0 : index
    %c0_6 = arith.constant 0 : index
    %3 = vector.load %arg2[%c0_5, %c0_6] : memref<4x16xbf16, #tpu.memory_space<vmem>>, vector<4x16xbf16>
    %4 = arith.truncf %0 : vector<16x512xf32> to vector<16x512xbf16>
    %cst = arith.constant dense<0.000000e+00> : vector<4x512xf32>
    %5 = tpu.matmul %3, %4, %cst {dimension_numbers = #tpu.dot_dimension_numbers<[1], [0], [0], [1], [0, 0, 1, 1], [], []>} : vector<4x16xbf16>, vector<16x512xbf16>, vector<4x512xf32> -> vector<4x512xf32>
    %c0_7 = arith.constant 0 : index
    %c0_8 = arith.constant 0 : index
    %6 = vector.load %arg3[%c0_7, %c0_8] : memref<4x1xf32, #tpu.memory_space<vmem>>, vector<4x1xf32>
    %7 = vector.broadcast %6 : vector<4x1xf32> to vector<4x512xf32>
    %8 = arith.addf %5, %7 : vector<4x512xf32>
    %cst_9 = arith.constant 0.000000e+00 : f32
    %9 = vector.broadcast %cst_9 : f32 to vector<4x512xf32>
    %10 = arith.subf %9, %8 : vector<4x512xf32>
    %11 = math.exp %10 : vector<4x512xf32>
    %cst_10 = arith.constant 1.000000e+00 : f32
    %12 = vector.broadcast %cst_10 : f32 to vector<4x512xf32>
    %13 = arith.addf %12, %11 : vector<4x512xf32>
    %14 = tpu.reciprocal %13 : vector<4x512xf32> -> vector<4x512xf32>
    %15 = arith.mulf %8, %14 : vector<4x512xf32>
    %c0_11 = arith.constant 0 : index
    %c0_12 = arith.constant 0 : index
    %16 = vector.load %arg4[%c0_11, %c0_12] : memref<4x25xf32, #tpu.memory_space<vmem>>, vector<4x25xf32>
    %c32_i32 = arith.constant 32 : i32
    %17 = tpu.dynamic_rotate %15 by %c32_i32 dim 1 : vector<4x512xf32>, i32 -> vector<4x512xf32>
    %18 = vector.extract_strided_slice %1 {offsets = [0, 0], sizes = [1, 512], strides = [1, 1]} : vector<5x512xf32> to vector<1x512xf32>
    %19 = vector.broadcast %18 : vector<1x512xf32> to vector<4x512xf32>
    %20 = arith.mulf %17, %19 : vector<4x512xf32>
    %c16_i32 = arith.constant 16 : i32
    %21 = tpu.dynamic_rotate %15 by %c16_i32 dim 1 : vector<4x512xf32>, i32 -> vector<4x512xf32>
    %22 = vector.extract_strided_slice %1 {offsets = [1, 0], sizes = [1, 512], strides = [1, 1]} : vector<5x512xf32> to vector<1x512xf32>
    %23 = vector.broadcast %22 : vector<1x512xf32> to vector<4x512xf32>
    %24 = arith.mulf %21, %23 : vector<4x512xf32>
    %c496_i32 = arith.constant 496 : i32
    %25 = tpu.dynamic_rotate %15 by %c496_i32 dim 1 : vector<4x512xf32>, i32 -> vector<4x512xf32>
    %26 = vector.extract_strided_slice %1 {offsets = [3, 0], sizes = [1, 512], strides = [1, 1]} : vector<5x512xf32> to vector<1x512xf32>
    %27 = vector.broadcast %26 : vector<1x512xf32> to vector<4x512xf32>
    %28 = arith.mulf %25, %27 : vector<4x512xf32>
    %c480_i32 = arith.constant 480 : i32
    %29 = tpu.dynamic_rotate %15 by %c480_i32 dim 1 : vector<4x512xf32>, i32 -> vector<4x512xf32>
    %30 = vector.extract_strided_slice %1 {offsets = [4, 0], sizes = [1, 512], strides = [1, 1]} : vector<5x512xf32> to vector<1x512xf32>
    %31 = vector.broadcast %30 : vector<1x512xf32> to vector<4x512xf32>
    %32 = arith.mulf %29, %31 : vector<4x512xf32>
    %33 = vector.extract_strided_slice %16 {offsets = [0, 0], sizes = [4, 1], strides = [1, 1]} : vector<4x25xf32> to vector<4x1xf32>
    %34 = vector.broadcast %33 : vector<4x1xf32> to vector<4x512xf32>
    %35 = arith.mulf %20, %34 : vector<4x512xf32>
    %36 = vector.extract_strided_slice %16 {offsets = [0, 5], sizes = [4, 1], strides = [1, 1]} : vector<4x25xf32> to vector<4x1xf32>
    %37 = vector.broadcast %36 : vector<4x1xf32> to vector<4x512xf32>
    %38 = arith.mulf %24, %37 : vector<4x512xf32>
    %39 = arith.addf %35, %38 : vector<4x512xf32>
    %40 = vector.extract_strided_slice %16 {offsets = [0, 10], sizes = [4, 1], strides = [1, 1]} : vector<4x25xf32> to vector<4x1xf32>
    %41 = vector.broadcast %40 : vector<4x1xf32> to vector<4x512xf32>
    %42 = arith.mulf %15, %41 : vector<4x512xf32>
    %43 = arith.addf %39, %42 : vector<4x512xf32>
    %44 = vector.extract_strided_slice %16 {offsets = [0, 15], sizes = [4, 1], strides = [1, 1]} : vector<4x25xf32> to vector<4x1xf32>
    %45 = vector.broadcast %44 : vector<4x1xf32> to vector<4x512xf32>
    %46 = arith.mulf %28, %45 : vector<4x512xf32>
    %47 = arith.addf %43, %46 : vector<4x512xf32>
    %48 = vector.extract_strided_slice %16 {offsets = [0, 20], sizes = [4, 1], strides = [1, 1]} : vector<4x25xf32> to vector<4x1xf32>
    %49 = vector.broadcast %48 : vector<4x1xf32> to vector<4x512xf32>
    %50 = arith.mulf %32, %49 : vector<4x512xf32>
    %51 = arith.addf %47, %50 : vector<4x512xf32>
    %c2_i32 = arith.constant 2 : i32
    %52 = tpu.dynamic_rotate %51 by %c2_i32 dim 1 : vector<4x512xf32>, i32 -> vector<4x512xf32>
    %53 = vector.extract_strided_slice %2 {offsets = [0, 0], sizes = [1, 512], strides = [1, 1]} : vector<5x512xf32> to vector<1x512xf32>
    %54 = vector.broadcast %53 : vector<1x512xf32> to vector<4x512xf32>
    %55 = arith.mulf %52, %54 : vector<4x512xf32>
    %56 = vector.extract_strided_slice %16 {offsets = [0, 1], sizes = [4, 1], strides = [1, 1]} : vector<4x25xf32> to vector<4x1xf32>
    %57 = vector.broadcast %56 : vector<4x1xf32> to vector<4x512xf32>
    %58 = arith.mulf %20, %57 : vector<4x512xf32>
    %59 = vector.extract_strided_slice %16 {offsets = [0, 6], sizes = [4, 1], strides = [1, 1]} : vector<4x25xf32> to vector<4x1xf32>
    %60 = vector.broadcast %59 : vector<4x1xf32> to vector<4x512xf32>
    %61 = arith.mulf %24, %60 : vector<4x512xf32>
    %62 = arith.addf %58, %61 : vector<4x512xf32>
    %63 = vector.extract_strided_slice %16 {offsets = [0, 11], sizes = [4, 1], strides = [1, 1]} : vector<4x25xf32> to vector<4x1xf32>
    %64 = vector.broadcast %63 : vector<4x1xf32> to vector<4x512xf32>
    %65 = arith.mulf %15, %64 : vector<4x512xf32>
    %66 = arith.addf %62, %65 : vector<4x512xf32>
    %67 = vector.extract_strided_slice %16 {offsets = [0, 16], sizes = [4, 1], strides = [1, 1]} : vector<4x25xf32> to vector<4x1xf32>
    %68 = vector.broadcast %67 : vector<4x1xf32> to vector<4x512xf32>
    %69 = arith.mulf %28, %68 : vector<4x512xf32>
    %70 = arith.addf %66, %69 : vector<4x512xf32>
    %71 = vector.extract_strided_slice %16 {offsets = [0, 21], sizes = [4, 1], strides = [1, 1]} : vector<4x25xf32> to vector<4x1xf32>
    %72 = vector.broadcast %71 : vector<4x1xf32> to vector<4x512xf32>
    %73 = arith.mulf %32, %72 : vector<4x512xf32>
    %74 = arith.addf %70, %73 : vector<4x512xf32>
    %c1_i32 = arith.constant 1 : i32
    %75 = tpu.dynamic_rotate %74 by %c1_i32 dim 1 : vector<4x512xf32>, i32 -> vector<4x512xf32>
    %76 = vector.extract_strided_slice %2 {offsets = [1, 0], sizes = [1, 512], strides = [1, 1]} : vector<5x512xf32> to vector<1x512xf32>
    %77 = vector.broadcast %76 : vector<1x512xf32> to vector<4x512xf32>
    %78 = arith.mulf %75, %77 : vector<4x512xf32>
    %79 = arith.addf %55, %78 : vector<4x512xf32>
    %80 = vector.extract_strided_slice %16 {offsets = [0, 2], sizes = [4, 1], strides = [1, 1]} : vector<4x25xf32> to vector<4x1xf32>
    %81 = vector.broadcast %80 : vector<4x1xf32> to vector<4x512xf32>
    %82 = arith.mulf %20, %81 : vector<4x512xf32>
    %83 = vector.extract_strided_slice %16 {offsets = [0, 7], sizes = [4, 1], strides = [1, 1]} : vector<4x25xf32> to vector<4x1xf32>
    %84 = vector.broadcast %83 : vector<4x1xf32> to vector<4x512xf32>
    %85 = arith.mulf %24, %84 : vector<4x512xf32>
    %86 = arith.addf %82, %85 : vector<4x512xf32>
    %87 = vector.extract_strided_slice %16 {offsets = [0, 12], sizes = [4, 1], strides = [1, 1]} : vector<4x25xf32> to vector<4x1xf32>
    %88 = vector.broadcast %87 : vector<4x1xf32> to vector<4x512xf32>
    %89 = arith.mulf %15, %88 : vector<4x512xf32>
    %90 = arith.addf %86, %89 : vector<4x512xf32>
    %91 = vector.extract_strided_slice %16 {offsets = [0, 17], sizes = [4, 1], strides = [1, 1]} : vector<4x25xf32> to vector<4x1xf32>
    %92 = vector.broadcast %91 : vector<4x1xf32> to vector<4x512xf32>
    %93 = arith.mulf %28, %92 : vector<4x512xf32>
    %94 = arith.addf %90, %93 : vector<4x512xf32>
    %95 = vector.extract_strided_slice %16 {offsets = [0, 22], sizes = [4, 1], strides = [1, 1]} : vector<4x25xf32> to vector<4x1xf32>
    %96 = vector.broadcast %95 : vector<4x1xf32> to vector<4x512xf32>
    %97 = arith.mulf %32, %96 : vector<4x512xf32>
    %98 = arith.addf %94, %97 : vector<4x512xf32>
    %99 = arith.addf %79, %98 : vector<4x512xf32>
    %100 = vector.extract_strided_slice %16 {offsets = [0, 3], sizes = [4, 1], strides = [1, 1]} : vector<4x25xf32> to vector<4x1xf32>
    %101 = vector.broadcast %100 : vector<4x1xf32> to vector<4x512xf32>
    %102 = arith.mulf %20, %101 : vector<4x512xf32>
    %103 = vector.extract_strided_slice %16 {offsets = [0, 8], sizes = [4, 1], strides = [1, 1]} : vector<4x25xf32> to vector<4x1xf32>
    %104 = vector.broadcast %103 : vector<4x1xf32> to vector<4x512xf32>
    %105 = arith.mulf %24, %104 : vector<4x512xf32>
    %106 = arith.addf %102, %105 : vector<4x512xf32>
    %107 = vector.extract_strided_slice %16 {offsets = [0, 13], sizes = [4, 1], strides = [1, 1]} : vector<4x25xf32> to vector<4x1xf32>
    %108 = vector.broadcast %107 : vector<4x1xf32> to vector<4x512xf32>
    %109 = arith.mulf %15, %108 : vector<4x512xf32>
    %110 = arith.addf %106, %109 : vector<4x512xf32>
    %111 = vector.extract_strided_slice %16 {offsets = [0, 18], sizes = [4, 1], strides = [1, 1]} : vector<4x25xf32> to vector<4x1xf32>
    %112 = vector.broadcast %111 : vector<4x1xf32> to vector<4x512xf32>
    %113 = arith.mulf %28, %112 : vector<4x512xf32>
    %114 = arith.addf %110, %113 : vector<4x512xf32>
    %115 = vector.extract_strided_slice %16 {offsets = [0, 23], sizes = [4, 1], strides = [1, 1]} : vector<4x25xf32> to vector<4x1xf32>
    %116 = vector.broadcast %115 : vector<4x1xf32> to vector<4x512xf32>
    %117 = arith.mulf %32, %116 : vector<4x512xf32>
    %118 = arith.addf %114, %117 : vector<4x512xf32>
    %c511_i32 = arith.constant 511 : i32
    %119 = tpu.dynamic_rotate %118 by %c511_i32 dim 1 : vector<4x512xf32>, i32 -> vector<4x512xf32>
    %120 = vector.extract_strided_slice %2 {offsets = [3, 0], sizes = [1, 512], strides = [1, 1]} : vector<5x512xf32> to vector<1x512xf32>
    %121 = vector.broadcast %120 : vector<1x512xf32> to vector<4x512xf32>
    %122 = arith.mulf %119, %121 : vector<4x512xf32>
    %123 = arith.addf %99, %122 : vector<4x512xf32>
    %124 = vector.extract_strided_slice %16 {offsets = [0, 4], sizes = [4, 1], strides = [1, 1]} : vector<4x25xf32> to vector<4x1xf32>
    %125 = vector.broadcast %124 : vector<4x1xf32> to vector<4x512xf32>
    %126 = arith.mulf %20, %125 : vector<4x512xf32>
    %127 = vector.extract_strided_slice %16 {offsets = [0, 9], sizes = [4, 1], strides = [1, 1]} : vector<4x25xf32> to vector<4x1xf32>
    %128 = vector.broadcast %127 : vector<4x1xf32> to vector<4x512xf32>
    %129 = arith.mulf %24, %128 : vector<4x512xf32>
    %130 = arith.addf %126, %129 : vector<4x512xf32>
    %131 = vector.extract_strided_slice %16 {offsets = [0, 14], sizes = [4, 1], strides = [1, 1]} : vector<4x25xf32> to vector<4x1xf32>
    %132 = vector.broadcast %131 : vector<4x1xf32> to vector<4x512xf32>
    %133 = arith.mulf %15, %132 : vector<4x512xf32>
    %134 = arith.addf %130, %133 : vector<4x512xf32>
    %135 = vector.extract_strided_slice %16 {offsets = [0, 19], sizes = [4, 1], strides = [1, 1]} : vector<4x25xf32> to vector<4x1xf32>
    %136 = vector.broadcast %135 : vector<4x1xf32> to vector<4x512xf32>
    %137 = arith.mulf %28, %136 : vector<4x512xf32>
    %138 = arith.addf %134, %137 : vector<4x512xf32>
    %139 = vector.extract_strided_slice %16 {offsets = [0, 24], sizes = [4, 1], strides = [1, 1]} : vector<4x25xf32> to vector<4x1xf32>
    %140 = vector.broadcast %139 : vector<4x1xf32> to vector<4x512xf32>
    %141 = arith.mulf %32, %140 : vector<4x512xf32>
    %142 = arith.addf %138, %141 : vector<4x512xf32>
    %c510_i32 = arith.constant 510 : i32
    %143 = tpu.dynamic_rotate %142 by %c510_i32 dim 1 : vector<4x512xf32>, i32 -> vector<4x512xf32>
    %144 = vector.extract_strided_slice %2 {offsets = [4, 0], sizes = [1, 512], strides = [1, 1]} : vector<5x512xf32> to vector<1x512xf32>
    %145 = vector.broadcast %144 : vector<1x512xf32> to vector<4x512xf32>
    %146 = arith.mulf %143, %145 : vector<4x512xf32>
    %147 = arith.addf %123, %146 : vector<4x512xf32>
    %c0_13 = arith.constant 0 : index
    %c0_14 = arith.constant 0 : index
    %148 = vector.load %arg5[%c0_13, %c0_14] : memref<4x1xf32, #tpu.memory_space<vmem>>, vector<4x1xf32>
    %149 = vector.broadcast %148 : vector<4x1xf32> to vector<4x512xf32>
    %150 = arith.addf %147, %149 : vector<4x512xf32>
    %cst_15 = arith.constant 0.000000e+00 : f32
    %151 = vector.broadcast %cst_15 : f32 to vector<4x512xf32>
    %152 = arith.subf %151, %150 : vector<4x512xf32>
    %153 = math.exp %152 : vector<4x512xf32>
    %cst_16 = arith.constant 1.000000e+00 : f32
    %154 = vector.broadcast %cst_16 : f32 to vector<4x512xf32>
    %155 = arith.addf %154, %153 : vector<4x512xf32>
    %156 = tpu.reciprocal %155 : vector<4x512xf32> -> vector<4x512xf32>
    %157 = arith.mulf %150, %156 : vector<4x512xf32>
    %c0_17 = arith.constant 0 : index
    %c0_18 = arith.constant 0 : index
    %158 = vector.load %arg6[%c0_17, %c0_18] : memref<8x8xbf16, #tpu.memory_space<vmem>>, vector<8x8xbf16>
    %159 = vector.extract_strided_slice %158 {offsets = [0, 0], sizes = [8, 4], strides = [1, 1]} : vector<8x8xbf16> to vector<8x4xbf16>
    %160 = arith.truncf %15 : vector<4x512xf32> to vector<4x512xbf16>
    %cst_19 = arith.constant dense<0.000000e+00> : vector<8x512xf32>
    %161 = tpu.matmul %159, %160, %cst_19 {dimension_numbers = #tpu.dot_dimension_numbers<[1], [0], [0], [1], [0, 0, 1, 1], [], []>} : vector<8x4xbf16>, vector<4x512xbf16>, vector<8x512xf32> -> vector<8x512xf32>
    %162 = vector.extract_strided_slice %158 {offsets = [0, 4], sizes = [8, 4], strides = [1, 1]} : vector<8x8xbf16> to vector<8x4xbf16>
    %163 = arith.truncf %157 : vector<4x512xf32> to vector<4x512xbf16>
    %cst_20 = arith.constant dense<0.000000e+00> : vector<8x512xf32>
    %164 = tpu.matmul %162, %163, %cst_20 {dimension_numbers = #tpu.dot_dimension_numbers<[1], [0], [0], [1], [0, 0, 1, 1], [], []>} : vector<8x4xbf16>, vector<4x512xbf16>, vector<8x512xf32> -> vector<8x512xf32>
    %165 = arith.addf %161, %164 : vector<8x512xf32>
    %c0_21 = arith.constant 0 : index
    %c0_22 = arith.constant 0 : index
    %166 = vector.load %arg7[%c0_21, %c0_22] : memref<8x1xf32, #tpu.memory_space<vmem>>, vector<8x1xf32>
    %167 = vector.broadcast %166 : vector<8x1xf32> to vector<8x512xf32>
    %168 = arith.addf %165, %167 : vector<8x512xf32>
    %c0_23 = arith.constant 0 : index
    %c0_24 = arith.constant 0 : index
    %169 = vector.load %arg8[%c0_23, %c0_24] : memref<8x25xf32, #tpu.memory_space<vmem>>, vector<8x25xf32>
    %c32_i32_25 = arith.constant 32 : i32
    %170 = tpu.dynamic_rotate %168 by %c32_i32_25 dim 1 : vector<8x512xf32>, i32 -> vector<8x512xf32>
    %171 = vector.extract_strided_slice %1 {offsets = [0, 0], sizes = [1, 512], strides = [1, 1]} : vector<5x512xf32> to vector<1x512xf32>
    %172 = vector.broadcast %171 : vector<1x512xf32> to vector<8x512xf32>
    %173 = arith.mulf %170, %172 : vector<8x512xf32>
    %c16_i32_26 = arith.constant 16 : i32
    %174 = tpu.dynamic_rotate %168 by %c16_i32_26 dim 1 : vector<8x512xf32>, i32 -> vector<8x512xf32>
    %175 = vector.extract_strided_slice %1 {offsets = [1, 0], sizes = [1, 512], strides = [1, 1]} : vector<5x512xf32> to vector<1x512xf32>
    %176 = vector.broadcast %175 : vector<1x512xf32> to vector<8x512xf32>
    %177 = arith.mulf %174, %176 : vector<8x512xf32>
    %c496_i32_27 = arith.constant 496 : i32
    %178 = tpu.dynamic_rotate %168 by %c496_i32_27 dim 1 : vector<8x512xf32>, i32 -> vector<8x512xf32>
    %179 = vector.extract_strided_slice %1 {offsets = [3, 0], sizes = [1, 512], strides = [1, 1]} : vector<5x512xf32> to vector<1x512xf32>
    %180 = vector.broadcast %179 : vector<1x512xf32> to vector<8x512xf32>
    %181 = arith.mulf %178, %180 : vector<8x512xf32>
    %c480_i32_28 = arith.constant 480 : i32
    %182 = tpu.dynamic_rotate %168 by %c480_i32_28 dim 1 : vector<8x512xf32>, i32 -> vector<8x512xf32>
    %183 = vector.extract_strided_slice %1 {offsets = [4, 0], sizes = [1, 512], strides = [1, 1]} : vector<5x512xf32> to vector<1x512xf32>
    %184 = vector.broadcast %183 : vector<1x512xf32> to vector<8x512xf32>
    %185 = arith.mulf %182, %184 : vector<8x512xf32>
    %186 = vector.extract_strided_slice %169 {offsets = [0, 0], sizes = [8, 1], strides = [1, 1]} : vector<8x25xf32> to vector<8x1xf32>
    %187 = vector.broadcast %186 : vector<8x1xf32> to vector<8x512xf32>
    %188 = arith.mulf %173, %187 : vector<8x512xf32>
    %189 = vector.extract_strided_slice %169 {offsets = [0, 5], sizes = [8, 1], strides = [1, 1]} : vector<8x25xf32> to vector<8x1xf32>
    %190 = vector.broadcast %189 : vector<8x1xf32> to vector<8x512xf32>
    %191 = arith.mulf %177, %190 : vector<8x512xf32>
    %192 = arith.addf %188, %191 : vector<8x512xf32>
    %193 = vector.extract_strided_slice %169 {offsets = [0, 10], sizes = [8, 1], strides = [1, 1]} : vector<8x25xf32> to vector<8x1xf32>
    %194 = vector.broadcast %193 : vector<8x1xf32> to vector<8x512xf32>
    %195 = arith.mulf %168, %194 : vector<8x512xf32>
    %196 = arith.addf %192, %195 : vector<8x512xf32>
    %197 = vector.extract_strided_slice %169 {offsets = [0, 15], sizes = [8, 1], strides = [1, 1]} : vector<8x25xf32> to vector<8x1xf32>
    %198 = vector.broadcast %197 : vector<8x1xf32> to vector<8x512xf32>
    %199 = arith.mulf %181, %198 : vector<8x512xf32>
    %200 = arith.addf %196, %199 : vector<8x512xf32>
    %201 = vector.extract_strided_slice %169 {offsets = [0, 20], sizes = [8, 1], strides = [1, 1]} : vector<8x25xf32> to vector<8x1xf32>
    %202 = vector.broadcast %201 : vector<8x1xf32> to vector<8x512xf32>
    %203 = arith.mulf %185, %202 : vector<8x512xf32>
    %204 = arith.addf %200, %203 : vector<8x512xf32>
    %c2_i32_29 = arith.constant 2 : i32
    %205 = tpu.dynamic_rotate %204 by %c2_i32_29 dim 1 : vector<8x512xf32>, i32 -> vector<8x512xf32>
    %206 = vector.extract_strided_slice %2 {offsets = [0, 0], sizes = [1, 512], strides = [1, 1]} : vector<5x512xf32> to vector<1x512xf32>
    %207 = vector.broadcast %206 : vector<1x512xf32> to vector<8x512xf32>
    %208 = arith.mulf %205, %207 : vector<8x512xf32>
    %209 = vector.extract_strided_slice %169 {offsets = [0, 1], sizes = [8, 1], strides = [1, 1]} : vector<8x25xf32> to vector<8x1xf32>
    %210 = vector.broadcast %209 : vector<8x1xf32> to vector<8x512xf32>
    %211 = arith.mulf %173, %210 : vector<8x512xf32>
    %212 = vector.extract_strided_slice %169 {offsets = [0, 6], sizes = [8, 1], strides = [1, 1]} : vector<8x25xf32> to vector<8x1xf32>
    %213 = vector.broadcast %212 : vector<8x1xf32> to vector<8x512xf32>
    %214 = arith.mulf %177, %213 : vector<8x512xf32>
    %215 = arith.addf %211, %214 : vector<8x512xf32>
    %216 = vector.extract_strided_slice %169 {offsets = [0, 11], sizes = [8, 1], strides = [1, 1]} : vector<8x25xf32> to vector<8x1xf32>
    %217 = vector.broadcast %216 : vector<8x1xf32> to vector<8x512xf32>
    %218 = arith.mulf %168, %217 : vector<8x512xf32>
    %219 = arith.addf %215, %218 : vector<8x512xf32>
    %220 = vector.extract_strided_slice %169 {offsets = [0, 16], sizes = [8, 1], strides = [1, 1]} : vector<8x25xf32> to vector<8x1xf32>
    %221 = vector.broadcast %220 : vector<8x1xf32> to vector<8x512xf32>
    %222 = arith.mulf %181, %221 : vector<8x512xf32>
    %223 = arith.addf %219, %222 : vector<8x512xf32>
    %224 = vector.extract_strided_slice %169 {offsets = [0, 21], sizes = [8, 1], strides = [1, 1]} : vector<8x25xf32> to vector<8x1xf32>
    %225 = vector.broadcast %224 : vector<8x1xf32> to vector<8x512xf32>
    %226 = arith.mulf %185, %225 : vector<8x512xf32>
    %227 = arith.addf %223, %226 : vector<8x512xf32>
    %c1_i32_30 = arith.constant 1 : i32
    %228 = tpu.dynamic_rotate %227 by %c1_i32_30 dim 1 : vector<8x512xf32>, i32 -> vector<8x512xf32>
    %229 = vector.extract_strided_slice %2 {offsets = [1, 0], sizes = [1, 512], strides = [1, 1]} : vector<5x512xf32> to vector<1x512xf32>
    %230 = vector.broadcast %229 : vector<1x512xf32> to vector<8x512xf32>
    %231 = arith.mulf %228, %230 : vector<8x512xf32>
    %232 = arith.addf %208, %231 : vector<8x512xf32>
    %233 = vector.extract_strided_slice %169 {offsets = [0, 2], sizes = [8, 1], strides = [1, 1]} : vector<8x25xf32> to vector<8x1xf32>
    %234 = vector.broadcast %233 : vector<8x1xf32> to vector<8x512xf32>
    %235 = arith.mulf %173, %234 : vector<8x512xf32>
    %236 = vector.extract_strided_slice %169 {offsets = [0, 7], sizes = [8, 1], strides = [1, 1]} : vector<8x25xf32> to vector<8x1xf32>
    %237 = vector.broadcast %236 : vector<8x1xf32> to vector<8x512xf32>
    %238 = arith.mulf %177, %237 : vector<8x512xf32>
    %239 = arith.addf %235, %238 : vector<8x512xf32>
    %240 = vector.extract_strided_slice %169 {offsets = [0, 12], sizes = [8, 1], strides = [1, 1]} : vector<8x25xf32> to vector<8x1xf32>
    %241 = vector.broadcast %240 : vector<8x1xf32> to vector<8x512xf32>
    %242 = arith.mulf %168, %241 : vector<8x512xf32>
    %243 = arith.addf %239, %242 : vector<8x512xf32>
    %244 = vector.extract_strided_slice %169 {offsets = [0, 17], sizes = [8, 1], strides = [1, 1]} : vector<8x25xf32> to vector<8x1xf32>
    %245 = vector.broadcast %244 : vector<8x1xf32> to vector<8x512xf32>
    %246 = arith.mulf %181, %245 : vector<8x512xf32>
    %247 = arith.addf %243, %246 : vector<8x512xf32>
    %248 = vector.extract_strided_slice %169 {offsets = [0, 22], sizes = [8, 1], strides = [1, 1]} : vector<8x25xf32> to vector<8x1xf32>
    %249 = vector.broadcast %248 : vector<8x1xf32> to vector<8x512xf32>
    %250 = arith.mulf %185, %249 : vector<8x512xf32>
    %251 = arith.addf %247, %250 : vector<8x512xf32>
    %252 = arith.addf %232, %251 : vector<8x512xf32>
    %253 = vector.extract_strided_slice %169 {offsets = [0, 3], sizes = [8, 1], strides = [1, 1]} : vector<8x25xf32> to vector<8x1xf32>
    %254 = vector.broadcast %253 : vector<8x1xf32> to vector<8x512xf32>
    %255 = arith.mulf %173, %254 : vector<8x512xf32>
    %256 = vector.extract_strided_slice %169 {offsets = [0, 8], sizes = [8, 1], strides = [1, 1]} : vector<8x25xf32> to vector<8x1xf32>
    %257 = vector.broadcast %256 : vector<8x1xf32> to vector<8x512xf32>
    %258 = arith.mulf %177, %257 : vector<8x512xf32>
    %259 = arith.addf %255, %258 : vector<8x512xf32>
    %260 = vector.extract_strided_slice %169 {offsets = [0, 13], sizes = [8, 1], strides = [1, 1]} : vector<8x25xf32> to vector<8x1xf32>
    %261 = vector.broadcast %260 : vector<8x1xf32> to vector<8x512xf32>
    %262 = arith.mulf %168, %261 : vector<8x512xf32>
    %263 = arith.addf %259, %262 : vector<8x512xf32>
    %264 = vector.extract_strided_slice %169 {offsets = [0, 18], sizes = [8, 1], strides = [1, 1]} : vector<8x25xf32> to vector<8x1xf32>
    %265 = vector.broadcast %264 : vector<8x1xf32> to vector<8x512xf32>
    %266 = arith.mulf %181, %265 : vector<8x512xf32>
    %267 = arith.addf %263, %266 : vector<8x512xf32>
    %268 = vector.extract_strided_slice %169 {offsets = [0, 23], sizes = [8, 1], strides = [1, 1]} : vector<8x25xf32> to vector<8x1xf32>
    %269 = vector.broadcast %268 : vector<8x1xf32> to vector<8x512xf32>
    %270 = arith.mulf %185, %269 : vector<8x512xf32>
    %271 = arith.addf %267, %270 : vector<8x512xf32>
    %c511_i32_31 = arith.constant 511 : i32
    %272 = tpu.dynamic_rotate %271 by %c511_i32_31 dim 1 : vector<8x512xf32>, i32 -> vector<8x512xf32>
    %273 = vector.extract_strided_slice %2 {offsets = [3, 0], sizes = [1, 512], strides = [1, 1]} : vector<5x512xf32> to vector<1x512xf32>
    %274 = vector.broadcast %273 : vector<1x512xf32> to vector<8x512xf32>
    %275 = arith.mulf %272, %274 : vector<8x512xf32>
    %276 = arith.addf %252, %275 : vector<8x512xf32>
    %277 = vector.extract_strided_slice %169 {offsets = [0, 4], sizes = [8, 1], strides = [1, 1]} : vector<8x25xf32> to vector<8x1xf32>
    %278 = vector.broadcast %277 : vector<8x1xf32> to vector<8x512xf32>
    %279 = arith.mulf %173, %278 : vector<8x512xf32>
    %280 = vector.extract_strided_slice %169 {offsets = [0, 9], sizes = [8, 1], strides = [1, 1]} : vector<8x25xf32> to vector<8x1xf32>
    %281 = vector.broadcast %280 : vector<8x1xf32> to vector<8x512xf32>
    %282 = arith.mulf %177, %281 : vector<8x512xf32>
    %283 = arith.addf %279, %282 : vector<8x512xf32>
    %284 = vector.extract_strided_slice %169 {offsets = [0, 14], sizes = [8, 1], strides = [1, 1]} : vector<8x25xf32> to vector<8x1xf32>
    %285 = vector.broadcast %284 : vector<8x1xf32> to vector<8x512xf32>
    %286 = arith.mulf %168, %285 : vector<8x512xf32>
    %287 = arith.addf %283, %286 : vector<8x512xf32>
    %288 = vector.extract_strided_slice %169 {offsets = [0, 19], sizes = [8, 1], strides = [1, 1]} : vector<8x25xf32> to vector<8x1xf32>
    %289 = vector.broadcast %288 : vector<8x1xf32> to vector<8x512xf32>
    %290 = arith.mulf %181, %289 : vector<8x512xf32>
    %291 = arith.addf %287, %290 : vector<8x512xf32>
    %292 = vector.extract_strided_slice %169 {offsets = [0, 24], sizes = [8, 1], strides = [1, 1]} : vector<8x25xf32> to vector<8x1xf32>
    %293 = vector.broadcast %292 : vector<8x1xf32> to vector<8x512xf32>
    %294 = arith.mulf %185, %293 : vector<8x512xf32>
    %295 = arith.addf %291, %294 : vector<8x512xf32>
    %c510_i32_32 = arith.constant 510 : i32
    %296 = tpu.dynamic_rotate %295 by %c510_i32_32 dim 1 : vector<8x512xf32>, i32 -> vector<8x512xf32>
    %297 = vector.extract_strided_slice %2 {offsets = [4, 0], sizes = [1, 512], strides = [1, 1]} : vector<5x512xf32> to vector<1x512xf32>
    %298 = vector.broadcast %297 : vector<1x512xf32> to vector<8x512xf32>
    %299 = arith.mulf %296, %298 : vector<8x512xf32>
    %300 = arith.addf %276, %299 : vector<8x512xf32>
    %c0_33 = arith.constant 0 : index
    %c0_34 = arith.constant 0 : index
    %301 = vector.load %arg9[%c0_33, %c0_34] : memref<8x1xf32, #tpu.memory_space<vmem>>, vector<8x1xf32>
    %302 = vector.broadcast %301 : vector<8x1xf32> to vector<8x512xf32>
    %303 = arith.addf %300, %302 : vector<8x512xf32>
    %304 = vector.extract_strided_slice %0 {offsets = [0, 0], sizes = [8, 512], strides = [1, 1]} : vector<16x512xf32> to vector<8x512xf32>
    %305 = arith.addf %168, %304 : vector<8x512xf32>
    %c0_35 = arith.constant 0 : index
    %c0_36 = arith.constant 0 : index
    %306 = vector.load %arg12[%c0_35, %c0_36] : memref<16x512xf32, #tpu.memory_space<vmem>>, vector<8x512xf32>
    tpu.vector_store %arg12[%c0_35, %c0_36], %305 {strides = array<i32>} : memref<16x512xf32, #tpu.memory_space<vmem>>, vector<8x512xf32>,
    %307 = vector.extract_strided_slice %0 {offsets = [8, 0], sizes = [8, 512], strides = [1, 1]} : vector<16x512xf32> to vector<8x512xf32>
    %308 = arith.addf %303, %307 : vector<8x512xf32>
    %c8 = arith.constant 8 : index
    %c0_37 = arith.constant 0 : index
    %309 = vector.load %arg12[%c8, %c0_37] : memref<16x512xf32, #tpu.memory_space<vmem>>, vector<8x512xf32>
    tpu.vector_store %arg12[%c8, %c0_37], %308 {strides = array<i32>} : memref<16x512xf32, #tpu.memory_space<vmem>>, vector<8x512xf32>,
    return
  }
  func.func @transform_0(%arg0: i32) -> (i32, i32) {
    %c0_i32 = arith.constant 0 : i32
    %c0_i32_0 = arith.constant 0 : i32
    return %c0_i32, %arg0 : i32, i32
  }
  func.func @transform_1(%arg0: i32) -> (i32, i32) {
    %c0_i32 = arith.constant 0 : i32
    %c0_i32_0 = arith.constant 0 : i32
    %c0_i32_1 = arith.constant 0 : i32
    return %c0_i32, %c0_i32_0 : i32, i32
  }
  func.func @transform_2(%arg0: i32) -> (i32, i32) {
    %c0_i32 = arith.constant 0 : i32
    %c0_i32_0 = arith.constant 0 : i32
    %c0_i32_1 = arith.constant 0 : i32
    return %c0_i32, %c0_i32_0 : i32, i32
  }
  func.func @transform_3(%arg0: i32) -> (i32, i32) {
    %c0_i32 = arith.constant 0 : i32
    %c0_i32_0 = arith.constant 0 : i32
    %c0_i32_1 = arith.constant 0 : i32
    return %c0_i32, %c0_i32_0 : i32, i32
  }
  func.func @transform_4(%arg0: i32) -> (i32, i32) {
    %c0_i32 = arith.constant 0 : i32
    %c0_i32_0 = arith.constant 0 : i32
    %c0_i32_1 = arith.constant 0 : i32
    return %c0_i32, %c0_i32_0 : i32, i32
  }
  func.func @transform_5(%arg0: i32) -> (i32, i32) {
    %c0_i32 = arith.constant 0 : i32
    %c0_i32_0 = arith.constant 0 : i32
    %c0_i32_1 = arith.constant 0 : i32
    return %c0_i32, %c0_i32_0 : i32, i32
  }
  func.func @transform_6(%arg0: i32) -> (i32, i32) {
    %c0_i32 = arith.constant 0 : i32
    %c0_i32_0 = arith.constant 0 : i32
    %c0_i32_1 = arith.constant 0 : i32
    return %c0_i32, %c0_i32_0 : i32, i32
  }
  func.func @transform_7(%arg0: i32) -> (i32, i32) {
    %c0_i32 = arith.constant 0 : i32
    %c0_i32_0 = arith.constant 0 : i32
    %c0_i32_1 = arith.constant 0 : i32
    return %c0_i32, %c0_i32_0 : i32, i32
  }
  func.func @transform_8(%arg0: i32) -> (i32, i32) {
    %c0_i32 = arith.constant 0 : i32
    %c0_i32_0 = arith.constant 0 : i32
    %c0_i32_1 = arith.constant 0 : i32
    return %c0_i32, %c0_i32_0 : i32, i32
  }
  func.func @transform_9(%arg0: i32) -> (i32, i32) {
    %c0_i32 = arith.constant 0 : i32
    %c0_i32_0 = arith.constant 0 : i32
    %c0_i32_1 = arith.constant 0 : i32
    return %c0_i32, %c0_i32_0 : i32, i32
  }
  func.func @transform_10(%arg0: i32) -> (i32, i32) {
    %c0_i32 = arith.constant 0 : i32
    %c0_i32_0 = arith.constant 0 : i32
    %c0_i32_1 = arith.constant 0 : i32
    return %c0_i32, %c0_i32_0 : i32, i32
  }
  func.func @transform_11(%arg0: i32) -> (i32, i32) {
    %c0_i32 = arith.constant 0 : i32
    %c0_i32_0 = arith.constant 0 : i32
    return %c0_i32, %arg0 : i32, i32
  }
}

</mosaic_0001>

<bundles_post_ra>
// kernel: tpu_custom_call.1
= control target key start
LH: loop header
LB: loop body
LE: loop exit
PB: predicated region body
PF: predicated region fallthrough
CT: control target
= control target key end

     0   :  { %s3900_s0 = inlined_call_operand.hbm [shape: f32[16,1024], index: 0, kind: input, shape index: {}]   ;;  %s3901_s1 = inlined_call_operand.vmem [shape: bf16[4,16], index: 1, kind: input, shape index: {}]   ;;  %s3902_s2 = inlined_call_operand.vmem [shape: f32[4,1], index: 2, kind: input, shape index: {}]   ;;  %s3903_s3 = inlined_call_operand.vmem [shape: f32[4,25], index: 3, kind: input, shape index: {}]   ;;  %s3904_s4 = inlined_call_operand.vmem [shape: f32[4,1], index: 4, kind: input, shape index: {}]   ;;  %s3905_s5 = inlined_call_operand.vmem [shape: bf16[8,8], index: 5, kind: input, shape index: {}]   ;;  %s3906_s6 = inlined_call_operand.vmem [shape: f32[8,1], index: 6, kind: input, shape index: {}]   ;;  %s3907_s7 = inlined_call_operand.vmem [shape: f32[8,25], index: 7, kind: input, shape index: {}]   ;;  %s3908_s8 = inlined_call_operand.vmem [shape: f32[8,1], index: 8, kind: input, shape index: {}]   ;;  %s3909_s9 = inlined_call_operand.hbm [shape: f32[5,512], index: 9, kind: input, shape index: {}]   ;;  %s3910_s10 = inlined_call_operand.hbm [shape: f32[5,512], index: 10, kind: input, shape index: {}]   ;;  %s3911_s11 = inlined_call_operand.hbm [shape: f32[16,1024], index: 11, kind: output, shape index: {}]  }
   0x1   :  { %4002 = sst [smem:[#allocation38_spill]] %s3909_s9 }
   0x2   :  { %4003 = sst [smem:[#allocation39_spill]] %s3910_s10 }
   0x3   :  { %4004 = sst [smem:[#allocation40_spill]] %s3911_s11 }
   0x4   :  { %16 = vsyncpa [#allocation3], 0 }
   0x5   :  { %18 = vsyncpa [#allocation3 + $0x1], 0 }
   0x6   :  { %19 = vsyncpa [#allocation6], 0 }
   0x7   :  { %20 = vsyncpa [#allocation4], 0 }
   0x8   :  { %22 = vsyncpa [#allocation4 + $0x1], 0  ;;  %s2367_s17 = smov 0   ;;  %s2369_s18 = smov 0  }
   0x9   :  { %s2371_s19 = smov 0   ;;  %s2373_s20 = smov 0  }
   0xa LB: > { %4005 = sst [smem:[#allocation12_spill]] %s2252_s17  ;;  %s2388_s21 = sadd.s32 4294967295, %s2264_s20   ;;  %s2264_s20 = sphi %s2373_s20, %s4164_s20   ;;  %s2260_s19 = sphi %s2371_s19, %s4168_s19   ;;  %s2256_s18 = sphi %s2369_s18, %s4167_s18   ;;  %s2252_s17 = sphi %s2367_s17, %s4166_s17  }
   0xb   : > { %s1872_s22 = sadd.s32 4294967294, %s2264_s20   ;;  %s2392_s23 = sadd.s32 1, %s2264_s20  }
   0xc   : > { %4006 = sst [smem:[#allocation13_spill]] %s2392_s23  ;;  %s35_s24 = sadd.s32 1, %s2260_s19 }
   0xd   : > { %s32_s25 = ssub.s32 %s2264_s20, %s2392_s23  ;;  %p42_p0 = scmp.ne.s32.totalorder %s2260_s19, %s2256_s18 }
   0xe   : > { %p33_p1 = scmp.eq.s32.totalorder %s32_s25, 0  ;;  %p43_p2 = scmp.eq.s32.totalorder %s2264_s20, 0 }
   0xf   : > { %p48_p3 = scmp.ne.s32.totalorder %s2256_s18, %s2252_s17  ;;  %p49_p4 = scmp.eq.s32.totalorder %s2388_s21, 0 }
  0x10   : > { %s2404_s26 = scalar_select %p33_p1, %s2260_s19, %s35_s24  }
  0x11   : > { %p2406_p5 = por %p43_p2, %p42_p0  ;;  %p2412_p6 = por %p49_p4, %p48_p3 }
  0x12   : > { %4007 = sst [smem:[#allocation14_spill]] %s2404_s26  ;;  %p282_p7 = scmp.eq.s32.totalorder %s2388_s21, 1 }
  0x13   : > { %p288_p8 = scmp.eq.s32.totalorder %s1872_s22, 1  ;;  %p1873_p9 = scmp.ge.s32.totalorder %s2264_s20, 1 }
  0x14   : > { %p295_p10 = scmp.lt.s32.totalorder %s2264_s20, 3  ;;  %p2419_p11 = por %p282_p7, %p42_p0 }
  0x15   : > { %p2423_p12 = por %p288_p8, %p48_p3  ;;  %s4015_s9 = sld [smem:[#allocation38_spill]] }
  0x16   : > { %s4010_s29 = scalar_select %p2419_p11, 1, 0 }
  0x17   : > { %s4012_s30 = scalar_select %p2423_p12, 1, 0 }
  0x18   : > { %4011 = sst [smem:[#allocation15_spill]] %s4010_s29  ;;  %p2427_p13 = pnand %p1873_p9, %p295_p10 }
  0x19   : > { %4013 = sst [smem:[#allocation16_spill]] %s4012_s30  ;;  %s2266_s16 = smov [#allocation5]  }
  0x1a   : > { %p1916_p1 = pneg %p2427_p13  ;;  %s333_s22 = sshll.u32 %s2266_s16, 4  ;;  %s334_s22 = int_to_ptr.vmem [resolvable:$true] %s333_s22 }
  0x1b   : > { %s331_s15 = sshll.u32 %s4015_s9, 4  ;;  %p1933_p3 = scmp.lt.s32.totalorder %s2264_s20, 2  ;;  %s332_s15 = int_to_ptr.hbm [resolvable:$true] %s331_s15 }
  0x1c   : > { %p1917_p2 = pnand %p1916_p1, %p49_p4  ;;  %s4016_s10 = sld [smem:[#allocation39_spill]] }
  0x1d   : > { %p2445_p7 = pnand %p1933_p3, %p2406_p5  ;;  %s2267_s14 = smov [#allocation7]  }
  0x1e   : > { %1919 = dma.hbm_to_vmem [thread:$0]  (!%p1917_p2), %s332_s15, 512, %s334_s22, [#allocation6]  }
  0x1f   : > { %s345_s9 = sshll.u32 %s2267_s14, 4  ;;  %s356_s23 = sand.u32 1, %s2260_s19   ;;  %s346_s9 = int_to_ptr.vmem [resolvable:$true] %s345_s9 }
  0x20   : > { %s1877_s16 = sshll.u32 %s356_s23, 6  ;;  %s1902_s30 = sshll.u32 %s2264_s20, 5 }
  0x21   : > { %s365_s24 = scalar_lea.hbm %s3900_s0, %s1902_s30  ;;  %s360_s25 = scalar_lea.vmem [#allocation2], %s1877_s16 }
  0x22   : > { %s343_s26 = sshll.u32 %s4016_s10, 4  ;;  %s368_s10 = sshll.u32 %s360_s25, 4  ;;  %s344_s26 = int_to_ptr.hbm [resolvable:$true] %s343_s26  ;;  %s369_s10 = int_to_ptr.vmem [resolvable:$true] %s368_s10 }
  0x23   : > { %1922 = dma.hbm_to_vmem [thread:$0]  (!%p1917_p2), %s344_s26, 512, %s346_s9, [#allocation6]  }
  0x24   : > { %s366_s15 = sshll.u32 %s365_s24, 4  ;;  %s357_s27 = scalar_lea.sflag [#allocation3], %s356_s23  ;;  %s367_s15 = int_to_ptr.hbm [resolvable:$true] %s366_s15 }
  0x25   : > { %s2164_s22 = sshra.s32 %s367_s15, 4  ;;  %p2168_p8 = pneg %p2445_p7  ;;  %s2165_s22 = int_to_ptr.hbm [resolvable:$true] %s2164_s22 }
  0x26   : > { %s2166_s11 = scalar_lea.hbm %s2165_s22, 64  ;;  %s2171_s14 = scalar_lea.hbm %s3900_s0, 128 }
  0x27   : > { %p2167_p5 = scmp.ne.s32.totalorder %s2165_s22, %s2166_s11  ;;  %p2172_p1 = scmp.lt.s32.totalorder %s2165_s22, %s3900_s0 }
  0x28   : > { %p2173_p2 = scmp.lt.s32.totalorder %s2171_s14, %s2166_s11 }
  0x29   : > { %p2169_p9 = pnand %p2168_p8, %p2167_p5 }
  0x2a   : > { %p2174_p3 = por %p2173_p2, %p2172_p1 }
  0x2b   : > { %p2170_p10 = pneg %p2169_p9 }
  0x2d   : > { %p2175_p0 = pnand %p2174_p3, %p2170_p10 }
  0x2f   : > { %2178 = shalt.err (!%p2175_p0)
}
  0x30   : > { %s2268_s23 = smov 1024   ;;  %s2269_s30 = smov 512  }
  0x31   : > { %s2270_s16 = smov 32   ;;  %380 = sbr.rel (%p2427_p13) target bundleno = 1061 (0x425), region = 64 }
  0x32   : > { %1926 = dma.hbm_to_vmem [thread:$0]  (!%p2445_p7), %s367_s15, 1024, %s369_s10, %s357_s27, %s2268_s23, %s2269_s30, %s2270_s16  }
  0x36   : > { %s2467_s24 = sand.u32 1, %s2256_s18  }
  0x37   : > { %s1881_s11 = sshll.u32 %s2467_s24, 6  ;;  %s383_s25 = scalar_lea.sflag [#allocation3], %s2467_s24 }
  0x38   : > { %s2473_s22 = scalar_lea.vmem [#allocation2], %s1881_s11 }
  0x39   : > { %2239 = dma.done.wait (%p2412_p6), %s383_s25, 1024  }
  0x3a   : > { %2241 = vsyncadd (%p2412_p6), %s383_s25, 4294966272 }
  0x3b   : > { %2243 = dma.done.wait (%p49_p4), [#allocation6], 1024  }
  0x3c   : > { %2245 = vsyncadd (%p49_p4), [#allocation6], 4294966272  ;;  %v2271_v0 = vmov 10   ;;  %v3919_v1 = vmov 0   ;;  %v2489_v2 = vld [vmem:[%s3903_s3] sm:$0xf] }
  0x3d   : > { %2013 = vset.pattern.permute.xlu1 %v2271_v0  ;;  %2010 = vset.pattern.permute.xlu0 %v3919_v1  ;;  %v439_v3 = vld [vmem:[%s2473_s22] sm:$0xff]  ;;  %v440_v6 = vld [vmem:[%s2473_s22 + $0x8] sm:$0xff]  ;;  %v441_v8 = vld [vmem:[%s2473_s22 + $0x10] sm:$0xff]  ;;  %vm466_vm0 = vcmask 130048   ;;  %v3946_v17 = vmov 20   ;;  %v3947_v18 = vmov 15  }
  0x3e   : > { %2011 = vset.pattern.permute.xlu2 %v3919_v1  ;;  %v443_v4 = vld [vmem:[%s2473_s22 + $0x20] sm:$0xff]  ;;  %707 = vperm.xlu1 %2013, %v2489_v2   ;;  %v444_v7 = vld [vmem:[%s2473_s22 + $0x28] sm:$0xff]  ;;  %v445_v10 = vld [vmem:[%s2473_s22 + $0x30] sm:$0xff]  ;;  %v3945_v19 = vmov 6   ;;  %v3944_v20 = vmov 11   ;;  %v3940_v21 = vmov 16  }
  0x3f   : > { %v456_v5 = vpack.c.bf16 %v443_v4, %v439_v3  ;;  %687 = vperm.xlu2 %2011, %v2489_v2   ;;  %v457_v9 = vpack.c.bf16 %v444_v7, %v440_v6  ;;  %v442_v11 = vld [vmem:[%s2473_s22 + $0x18] sm:$0xff]  ;;  %v458_v13 = vpack.c.bf16 %v445_v10, %v441_v8  ;;  %v455_v15 = vld [vmem:[%s3901_s1] sm:$0x3]  ;;  %v3941_v22 = vmov 21   ;;  %s2291_s9 = smov 16   ;;  %s2292_s26 = smov 32  }
  0x40   : > { %v446_v12 = vld [vmem:[%s2473_s22 + $0x38] sm:$0xff]  ;;  %v460_v16 = vld [vmem:[%s3902_s2] sm:$0xf]  ;;  %v3939_v23 = vmov 8   ;;  %v3930_v24 = vmov 13   ;;  %v3929_v25 = vmov 4  }
  0x41   : > { %477 = vmatpush.bf16.msra.mxu0 %v456_v5  ;;  %v459_v14 = vpack.c.bf16 %v446_v12, %v442_v11  ;;  %490 = vmatpush.bf16.msra.mxu1 %v457_v9  ;;  %v3933_v26 = vmov 14   ;;  %v3948_v27 = vmov 5   ;;  %v3928_v28 = vmov 9   ;;  %s2295_s14 = smov 96   ;;  %s2296_s17 = smov 112  }
  0x42   : > { %463 = vperm.xlu0 %2010, %v460_v16   ;;  %503 = vmatpush.bf16.msra.mxu2 %v458_v13  ;;  %v3943_v29 = vmov 1   ;;  %v3924_v30 = vmov 23   ;;  %v3931_v31 = vmov 3   ;;  %v3923_v34 = vmov 19   ;;  %s2300_s29 = smov 1   ;;  %s2301_s23 = smov 2  }
  0x43   : > { %516 = vmatpush.bf16.msra.mxu3 %v459_v14  ;;  %v3921_v35 = vmov 24   ;;  %v3926_v38 = vmov 18   ;;  %s2302_s30 = smov 127   ;;  %s2303_s16 = smov 126  }
  0x44   : > { %1885 = vmatmul.msk.bf16.vlgmr.msra.gmra.mxu0 %vm466_vm0, %v455_v15  ;;  %1886 = vmatmul.msk.bf16.vlgmr.msra.gmra.mxu1 %vm466_vm0, %v455_v15  ;;  %s2304_s27 = smov 124   ;;  %s3300_s28 = scalar_lea.vmem [#allocation8], %s1881_s11 }
  0x45   : > { %1887 = vmatmul.msk.bf16.vlgmr.msra.gmra.mxu2 %vm466_vm0, %v455_v15  ;;  %s1765_s13 = scalar_lea.sflag [#allocation4], %s2467_s24 }
  0x46   : > { %1888 = vmatmul.msk.bf16.vlgmr.msra.gmra.mxu3 %vm466_vm0, %v455_v15  ;;  %2015 = vset.pattern.permute.xlu1 %v3946_v17  ;;  %v2789_v17 = vld [vmem:[#allocation5 + $0x18] sm:$0x1f] }
  0x47   : > { %731 = vperm.xlu1 %2015, %v2489_v2   ;;  %2014 = vset.pattern.permute.xlu2 %v3947_v18 }
  0x48   : > { %719 = vperm.xlu2 %2014, %v2489_v2  }
  0x4a   : > { %2012 = vset.pattern.permute.xlu0 %v3948_v27 }
  0x4b   : > { %695 = vperm.xlu0 %2012, %v2489_v2  }
  0x4f   : > { %2017 = vset.pattern.permute.xlu1 %v3945_v19 }
  0x50   : > { %772 = vperm.xlu1 %2017, %v2489_v2   ;;  %2018 = vset.pattern.permute.xlu2 %v3944_v20 }
  0x51   : > { %784 = vperm.xlu2 %2018, %v2489_v2  }
  0x53   : > { %2016 = vset.pattern.permute.xlu0 %v3943_v29 }
  0x54   : > { %764 = vperm.xlu0 %2016, %v2489_v2  }
  0x58   : > { %2019 = vset.pattern.permute.xlu1 %v3940_v21 }
  0x59   : > { %796 = vperm.xlu1 %2019, %v2489_v2   ;;  %2020 = vset.pattern.permute.xlu2 %v3941_v22 }
  0x5a   : > { %808 = vperm.xlu2 %2020, %v2489_v2  }
  0x5c   : > { %2021 = vset.pattern.permute.xlu0 %v3931_v31 }
  0x5d   : > { %905 = vperm.xlu0 %2021, %v2489_v2  }
  0x61   : > { %2022 = vset.pattern.permute.xlu1 %v3939_v23 }
  0x62   : > { %913 = vperm.xlu1 %2022, %v2489_v2   ;;  %2023 = vset.pattern.permute.xlu2 %v3930_v24 }
  0x63   : > { %925 = vperm.xlu2 %2023, %v2489_v2  }
  0x65   : > { %2026 = vset.pattern.permute.xlu0 %v3926_v38 }
  0x66   : > { %937 = vperm.xlu0 %2026, %v2489_v2  }
  0x6a   : > { %2024 = vset.pattern.permute.xlu1 %v3929_v25 }
  0x6b   : > { %986 = vperm.xlu1 %2024, %v2489_v2   ;;  %2025 = vset.pattern.permute.xlu2 %v3928_v28 }
  0x6c   : > { %994 = vperm.xlu2 %2025, %v2489_v2  }
  0x73   : > { %2027 = vset.pattern.permute.xlu1 %v3933_v26 }
  0x74   : > { %1006 = vperm.xlu1 %2027, %v2489_v2   ;;  %2028 = vset.pattern.permute.xlu2 %v3924_v30 }
  0x75   : > { %949 = vperm.xlu2 %2028, %v2489_v2  }
  0x7c   : > { %2029 = vset.pattern.permute.xlu1 %v3923_v34 }
  0x7d   : > { %2030 = vset.pattern.permute.xlu2 %v3921_v35  ;;  %1018 = vperm.xlu1 %2029, %v2489_v2  }
  0x7e   : > { %1030 = vperm.xlu2 %2030, %v2489_v2  }
  0xb4   : > { %v464_v32 = vpop.permute.xlu0 %463 }
  0xc1   : > { %v479_v33 = vpop.f32.mrf.mxu0  ;;  %v492_v37 = vpop.f32.mrf.mxu1 }
  0xc2   : > { %v2539_v36 = vadd.f32 %v479_v33, %v464_v32  ;;  %v2543_v39 = vadd.f32 %v492_v37, %v464_v32 }
  0xc4   : > { %v522_v40 = vsub.f32 0.0, %v2539_v36  ;;  %v523_v41 = vsub.f32 0.0, %v2543_v39 }
  0xc6   : > { %v526_v42 = vmul.f32 1.442695, %v522_v40  ;;  %v528_v43 = vmul.f32 1.442695, %v523_v41 }
  0xc8   : > { %2064 = vpow2.f32 %v526_v42  ;;  %v505_v44 = vpop.f32.mrf.mxu2 }
  0xc9   : > { %2066 = vpow2.f32 %v528_v43  ;;  %v518_v45 = vpop.f32.mrf.mxu3  ;;  %v2549_v46 = vadd.f32 %v505_v44, %v464_v32  ;;  %v481_v48 = vpop.f32.mrf.mxu0 }
  0xca   : > { %v2551_v47 = vadd.f32 %v518_v45, %v464_v32  ;;  %v494_v49 = vpop.f32.mrf.mxu1 }
  0xcb   : > { %v524_v50 = vsub.f32 0.0, %v2549_v46 }
  0xcc   : > { %v525_v51 = vsub.f32 0.0, %v2551_v47 }
  0xcd   : > { %v530_v53 = vmul.f32 1.442695, %v524_v50 }
  0xce   : > { %v2065_v52 = vpop.eup %2064  ;;  %v532_v56 = vmul.f32 1.442695, %v525_v51 }
  0xcf   : > { %v2067_v54 = vpop.eup %2066  ;;  %v534_v55 = vadd.f32 1.0, %v2065_v52  ;;  %2068 = vpow2.f32 %v530_v53  ;;  %v3942_v52 = vmov 2  }
  0xd0   : > { %v535_v57 = vadd.f32 1.0, %v2067_v54  ;;  %v507_v58 = vpop.f32.mrf.mxu2  ;;  %2031 = vset.pattern.permute.xlu0 %v3942_v52 }
  0xd1   : > { %2070 = vrcp.f32 %v534_v55  ;;  %v520_v59 = vpop.f32.mrf.mxu3  ;;  %v547_v8 = vand.u32 2147483647, %v534_v55  ;;  %v549_v9 = vand.u32 2147483648, %v534_v55  ;;  %vm543_vm3 = vweird.f32 %v534_v55 }
  0xd2   : > { %2072 = vrcp.f32 %v535_v57  ;;  %v563_v12 = vand.u32 2147483648, %v535_v57  ;;  %v561_v14 = vand.u32 2147483647, %v535_v57  ;;  %vm557_vm5 = vweird.f32 %v535_v57 }
  0xd3   : > { %2074 = vpow2.f32 %v532_v56  ;;  %v550_v16 = vor.u32 1.1754944e-38, %v549_v9  ;;  %vm548_vm6 = vcmp.eq.f32.partialorder %v547_v8, 8.507059e+37 }
  0xd4   : > { %v564_v37 = vor.u32 1.1754944e-38, %v563_v12  ;;  %vm562_vm8 = vcmp.eq.f32.partialorder %v561_v14, 8.507059e+37 }
  0xd5   : > { %v2069_v60 = vpop.eup %2068 }
  0xd6   : > { %v2555_v62 = vadd.f32 1.0, %v2069_v60  ;;  %v3935_v60 = vmov 7  }
  0xd7   : > { %v2071_v61 = vpop.eup %2070  ;;  %2032 = vset.pattern.permute.xlu1 %v3935_v60 }
  0xd8   : > { %v2073_v63 = vpop.eup %2072  ;;  %v539_v3 = vmul.f32 %v2071_v61, %v534_v55  ;;  %2076 = vrcp.f32 %v2555_v62  ;;  %vm544_vm1 = vweird.f32 %v2071_v61  ;;  %vm571_vm14 = vweird.f32 %v2555_v62 }
  0xd9   : > { %v2075_v4 = vpop.eup %2074  ;;  %v553_v5 = vmul.f32 %v2073_v63, %v535_v57  ;;  %vm558_vm2 = vweird.f32 %v2073_v63  ;;  %vm545_vm4 = vmor %vm543_vm3, %vm544_vm1 }
  0xda   : > { %v540_v6 = vsub.f32 1.0, %v539_v3  ;;  %v537_v7 = vadd.f32 1.0, %v2075_v4  ;;  %vm559_vm7 = vmor %vm557_vm5, %vm558_vm2  ;;  %v577_v4 = vand.u32 2147483648, %v2555_v62 }
  0xdb   : > { %v554_v10 = vsub.f32 1.0, %v553_v5 }
  0xdc   : > { %v541_v11 = vmul.f32 %v2071_v61, %v540_v6  ;;  %2078 = vrcp.f32 %v537_v7  ;;  %v591_v55 = vand.u32 2147483648, %v537_v7  ;;  %vm585_vm10 = vweird.f32 %v537_v7 }
  0xdd   : > { %v555_v13 = vmul.f32 %v2073_v63, %v554_v10  ;;  %v589_v56 = vand.u32 2147483647, %v537_v7  ;;  %v575_v6 = vand.u32 2147483647, %v2555_v62  ;;  %v578_v8 = vor.u32 1.1754944e-38, %v577_v4 }
  0xde   : > { %v542_v15 = vadd.f32 %v2071_v61, %v541_v11  ;;  %v2077_v40 = vpop.eup %2076  ;;  %v592_v59 = vor.u32 1.1754944e-38, %v591_v55 }
  0xdf   : > { %v556_v32 = vadd.f32 %v2073_v63, %v555_v13  ;;  %v567_v50 = vmul.f32 %v2077_v40, %v2555_v62  ;;  %vm590_vm12 = vcmp.eq.f32.partialorder %v589_v56, 8.507059e+37  ;;  %vm572_vm13 = vweird.f32 %v2077_v40 }
  0xe0   : > { %v546_v33 = vsel %vm545_vm4, %v2071_v61, %v542_v15  ;;  %vm573_vm15 = vmor %vm571_vm14, %vm572_vm13  ;;  %vm576_vm0 = vcmp.eq.f32.partialorder %v575_v6, 8.507059e+37  ;;  %v3922_v13 = vmov 22  }
  0xe1   : > { %v551_v41 = vsel %vm548_vm6, %v550_v16, %v546_v33  ;;  %v560_v42 = vsel %vm559_vm7, %v2073_v63, %v556_v32  ;;  %v568_v53 = vsub.f32 1.0, %v567_v50  ;;  %v2580_v63 = vpop.permute.xlu2 %687  ;;  %v3932_v16 = vmov 17  }
  0xe2   : > { %v2079_v43 = vpop.eup %2078  ;;  %v2559_v44 = vmul.f32 %v551_v41, %v2539_v36  ;;  %v565_v45 = vsel %vm562_vm8, %v564_v37, %v560_v42  ;;  %v3934_v36 = vmov 12  }
  0xe3   : > { %v2562_v48 = vmul.f32 %v565_v45, %v2543_v39  ;;  %v581_v49 = vmul.f32 %v2079_v43, %v537_v7  ;;  %2033 = vset.pattern.permute.xlu2 %v3934_v36  ;;  %vm586_vm9 = vweird.f32 %v2079_v43  ;;  %v569_v58 = vmul.f32 %v2077_v40, %v568_v53 }
  0xe4   : > { %4018 = vst [vmem:[#allocation17_spill] sm:$0xff] %v2559_v44  ;;  %622 = vrot.lane.b32.xlu2 %v2559_v44, %s2291_s9  ;;  %599 = vrot.lane.b32.xlu0 %v2559_v44, %s2292_s26  ;;  %vm587_vm11 = vmor %vm585_vm10, %vm586_vm9 }
  0xe5   : > { %4019 = vst [vmem:[#allocation18_spill] sm:$0xff] %v2562_v48  ;;  %v582_v51 = vsub.f32 1.0, %v581_v49  ;;  %601 = vrot.lane.b32.xlu1 %v2562_v48, %s2292_s26  ;;  %v570_v3 = vadd.f32 %v2077_v40, %v569_v58 }
  0xe7   : > { %v583_v39 = vmul.f32 %v2079_v43, %v582_v51  ;;  %v574_v7 = vsel %vm573_vm15, %v2077_v40, %v570_v3 }
  0xe8   : > { %v579_v9 = vsel %vm576_vm0, %v578_v8, %v574_v7  ;;  %v2680_v8 = vld [vmem:[#allocation5] sm:$0x1f] }
  0xe9   : > { %v584_v54 = vadd.f32 %v2079_v43, %v583_v39  ;;  %v2597_v10 = vmul.f32 %v579_v9, %v2549_v46  ;;  %v2613_v46 = vpop.permute.xlu1 %707  ;;  %v3938_v30 = vperm.slane %v2680_v8, 0 }
  0xea   : > { %v711_v36 = vmul.f32 %v2613_v46, %v2562_v48  ;;  %v710_v60 = vmul.f32 %v2613_v46, %v2559_v44 }
  0xeb   : > { %v588_v57 = vsel %vm587_vm11, %v2079_v43, %v584_v54  ;;  %4021 = vst [vmem:[#allocation20_spill] sm:$0xff] %v2597_v10  ;;  %v607_v54 = vlaneseq  ;;  %v2766_v21 = vmul.f32 %v2613_v46, %v2597_v10 }
  0xec   : > { %666 = vrot.lane.b32.xlu2 %v2562_v48, %s2295_s14  ;;  %624 = vrot.lane.b32.xlu0 %v2562_v48, %s2291_s9  ;;  %v593_v61 = vsel %vm590_vm12, %v592_v59, %v588_v57  ;;  %v2669_v59 = vld [vmem:[#allocation5 + $0x8] sm:$0x1f] }
  0xed   : > { %645 = vrot.lane.b32.xlu1 %v2562_v48, %s2296_s17  ;;  %v2584_v5 = vmul.f32 %v593_v61, %v2551_v47  ;;  %v2594_v47 = vpop.permute.xlu2 %719  ;;  %v2663_v55 = vand.u32 127, %v607_v54  ;;  %v3925_v61 = vperm.slane %v2669_v59, 0  ;;  %v3927_v4 = vperm.slane %v2669_v59, 1 }
  0xee   : > { %v3936_v34 = vperm.slane %v2669_v59, 3 }
  0xef   : > { %4020 = vst [vmem:[#allocation19_spill] sm:$0xff] %v2584_v5  ;;  %vm609_vm1 = vcmp.lt.s32.totalorder %v2663_v55, 32  ;;  %vm630_vm2 = vcmp.lt.s32.totalorder %v2663_v55, 16  ;;  %vm651_vm3 = vcmp.lt.s32.totalorder %v2663_v55, 112  ;;  %vm672_vm4 = vcmp.lt.s32.totalorder %v2663_v55, 96 }
  0xf0   : > { %vm827_vm5 = vcmp.lt.s32.totalorder %v2663_v55, 1  ;;  %vm750_vm6 = vcmp.lt.s32.totalorder %v2663_v55, 2  ;;  %vm3966_vm7 = vcmp.lt.s32.totalorder %v2663_v55, 127  ;;  %vm3965_vm8 = vcmp.lt.s32.totalorder %v2663_v55, 126 }
  0xf1   : > { %v2621_v12 = vpop.permute.xlu1 %731 }
  0xf4   : > { %605 = vrot.lane.b32.xlu2 %v2584_v5, %s2292_s26  ;;  %643 = vrot.lane.b32.xlu0 %v2559_v44, %s2296_s17 }
  0xf5   : > { %664 = vrot.lane.b32.xlu1 %v2559_v44, %s2295_s14  ;;  %v2605_v62 = vpop.permute.xlu2 %784 }
  0xf6   : > { %v2714_v28 = vmul.f32 %v2605_v62, %v2559_v44  ;;  %v788_v24 = vmul.f32 %v2605_v62, %v2562_v48 }
  0xf9   : > { %v2629_v15 = vpop.permute.xlu1 %772 }
  0xfc   : > { %628 = vrot.lane.b32.xlu2 %v2584_v5, %s2291_s9  ;;  %649 = vrot.lane.b32.xlu0 %v2584_v5, %s2296_s17 }
  0xfd   : > { %603 = vrot.lane.b32.xlu1 %v2597_v10, %s2292_s26  ;;  %v2619_v11 = vpop.permute.xlu2 %808 }
 0x101   : > { %v2637_v33 = vpop.permute.xlu1 %796 }
 0x104   : > { %647 = vrot.lane.b32.xlu2 %v2597_v10, %s2296_s17  ;;  %668 = vrot.lane.b32.xlu0 %v2597_v10, %s2295_s14 }
 0x105   : > { %626 = vrot.lane.b32.xlu1 %v2597_v10, %s2291_s9  ;;  %v2627_v14 = vpop.permute.xlu2 %925 }
 0x106   : > { %v2720_v31 = vmul.f32 %v2627_v14, %v2559_v44  ;;  %v2770_v22 = vmul.f32 %v2627_v14, %v2584_v5 }
 0x109   : > { %v2643_v40 = vpop.permute.xlu1 %913 }
 0x10c   : > { %865 = vperm.xlu2 %2033, %v2489_v2   ;;  %845 = vperm.xlu0 %2031, %v2489_v2  }
 0x10d   : > { %670 = vrot.lane.b32.xlu1 %v2584_v5, %s2295_s14  ;;  %v2634_v32 = vpop.permute.xlu2 %994 }
 0x111   : > { %v2649_v43 = vpop.permute.xlu1 %986 }
 0x114   : > { %2035 = vset.pattern.permute.xlu2 %v3922_v13  ;;  %2039 = vset.pattern.permute.xlu0 %v2271_v0  ;;  %v2641_v0 = vpop.permute.xlu0 %695  ;;  %v3937_v13 = vperm.slane %v2680_v8, 1 }
 0x115   : > { %853 = vperm.xlu1 %2032, %v2489_v2   ;;  %889 = vperm.xlu2 %2035, %v2489_v2   ;;  %v2639_v37 = vpop.permute.xlu2 %949 }
 0x116   : > { %4022 = vst [vmem:[#allocation21_spill] sm:$0xff] %v2639_v37 }
 0x119   : > { %v2653_v49 = vpop.permute.xlu1 %1006 }
 0x11a   : > { %4024 = vst [vmem:[#allocation23_spill] sm:$0xff] %v2653_v49 }
 0x11c   : > { %v2647_v42 = vpop.permute.xlu0 %764 }
 0x11d   : > { %2034 = vset.pattern.permute.xlu1 %v3932_v16  ;;  %2036 = vset.pattern.permute.xlu2 %v3919_v1  ;;  %v2645_v41 = vpop.permute.xlu2 %1030  ;;  %v929_v16 = vmul.f32 %v2627_v14, %v2562_v48 }
 0x11e   : > { %877 = vperm.xlu1 %2034, %v2489_v2   ;;  %4023 = vst [vmem:[#allocation22_spill] sm:$0xff] %v2645_v41 }
 0x121   : > { %v2659_v39 = vpop.permute.xlu1 %1018 }
 0x122   : > { %4025 = vst [vmem:[#allocation24_spill] sm:$0xff] %v2659_v39 }
 0x124   : > { %v2651_v2 = vpop.permute.xlu0 %905 }
 0x126   : > { %2037 = vset.pattern.permute.xlu1 %v3919_v1 }
 0x12c   : > { %v2657_v51 = vpop.permute.xlu0 %937 }
 0x13e   : > { %v623_v45 = vpop.permute.xlu2 %622 }
 0x146   : > { %v2655_v50 = vpop.permute.xlu2 %666 }
 0x14e   : > { %v2661_v53 = vpop.permute.xlu2 %605 }
 0x156   : > { %v600_v56 = vpop.permute.xlu0 %599  ;;  %v2667_v58 = vpop.permute.xlu2 %628 }
 0x157   : > { %v2665_v57 = vpop.permute.xlu1 %601 }
 0x158   : > { %v612_v3 = vsel %vm609_vm1, %v600_v56, %v2665_v57 }
 0x159   : > { %v2684_v9 = vmul.f32 %v3925_v61, %v612_v3 }
 0x15b   : > { %v909_v61 = vmul.f32 %v2651_v2, %v2684_v9  ;;  %v768_v52 = vmul.f32 %v2647_v42, %v2684_v9  ;;  %v691_v29 = vmul.f32 %v2580_v63, %v2684_v9 }
 0x15e   : > { %v2678_v7 = vpop.permute.xlu0 %624  ;;  %v2690_v1 = vpop.permute.xlu2 %647 }
 0x15f   : > { %v646_v6 = vpop.permute.xlu1 %645  ;;  %v633_v54 = vsel %vm630_vm2, %v623_v45, %v2678_v7 }
 0x160   : > { %v2694_v35 = vmul.f32 %v3927_v4, %v633_v54  ;;  %v653_v3 = vsel %vm651_vm3, %v646_v6, %v2690_v1  ;;  %v634_v54 = vsel %vm630_vm2, %v2667_v58, %v623_v45  ;;  %v613_v4 = vsel %vm609_vm1, %v2661_v53, %v600_v56 }
 0x161   : > { %v2726_v45 = vmul.f32 %v3936_v34, %v653_v3  ;;  %v2746_v3 = vmul.f32 %v2605_v62, %v2597_v10  ;;  %v2750_v34 = vmul.f32 %v2627_v14, %v2597_v10 }
 0x162   : > { %4026 = vst [vmem:[#allocation25_spill] sm:$0xff] %v2694_v35  ;;  %v917_v38 = vmul.f32 %v2643_v40, %v2694_v35  ;;  %v699_v23 = vmul.f32 %v2641_v0, %v2694_v35 }
 0x164   : > { %v921_v25 = vadd.f32 %v917_v38, %v909_v61  ;;  %v2734_v38 = vmul.f32 %v3937_v13, %v634_v54  ;;  %v2738_v61 = vmul.f32 %v3938_v30, %v613_v4  ;;  %v2754_v54 = vmul.f32 %v2653_v49, %v2559_v44 }
 0x165   : > { %v2758_v13 = vmul.f32 %v2605_v62, %v2584_v5  ;;  %v776_v30 = vmul.f32 %v2629_v15, %v2694_v35  ;;  %v941_v62 = vmul.f32 %v2657_v51, %v2726_v45 }
 0x166   : > { %v2730_v26 = vpop.permute.xlu0 %643  ;;  %4027 = vst [vmem:[#allocation26_spill] sm:$0xff] %v2754_v54  ;;  %v933_v4 = vadd.f32 %v929_v16, %v921_v25  ;;  %v2776_v16 = vld [vmem:[#allocation5 + $0x10] sm:$0x1f]  ;;  %v690_v20 = vmul.f32 %v2580_v63, %v2738_v61  ;;  %v698_v14 = vmul.f32 %v2641_v0, %v2734_v38  ;;  %v908_v18 = vmul.f32 %v2651_v2, %v2738_v61 }
 0x167   : > { %v2728_v56 = vpop.permute.xlu1 %664  ;;  %v654_v19 = vsel %vm651_vm3, %v2730_v26, %v646_v6  ;;  %v916_v27 = vmul.f32 %v2643_v40, %v2734_v38  ;;  %v780_v41 = vadd.f32 %v776_v30, %v768_v52  ;;  %v703_v54 = vadd.f32 %v699_v23, %v691_v29 }
 0x168   : > { %v2795_v25 = vadd.f32 %v941_v62, %v933_v4  ;;  %v767_v39 = vmul.f32 %v2647_v42, %v2738_v61  ;;  %v775_v10 = vmul.f32 %v2629_v15, %v2734_v38  ;;  %v2803_v6 = vmul.f32 %v2653_v49, %v2584_v5 }
 0x169   : > { %v2809_v30 = vmul.f32 %v2613_v46, %v2584_v5  ;;  %v675_v23 = vsel %vm672_vm4, %v2728_v56, %v2655_v50  ;;  %v4031_v29 = vperm.slane %v2680_v8, 3  ;;  %v702_v48 = vadd.f32 %v698_v14, %v690_v20 }
 0x16a   : > { %4028 = vst [vmem:[#allocation27_spill] sm:$0xff] %v2795_v25  ;;  %v920_v37 = vadd.f32 %v916_v27, %v908_v18  ;;  %v989_v25 = vmul.f32 %v2649_v43, %v2738_v61  ;;  %v997_v46 = vmul.f32 %v2634_v32, %v2734_v38  ;;  %v792_v49 = vadd.f32 %v788_v24, %v780_v41 }
 0x16b   : > { %4029 = vst [vmem:[#allocation28_spill] sm:$0xff] %v2803_v6  ;;  %v2817_v52 = vmul.f32 %v4031_v29, %v654_v19  ;;  %v715_v5 = vadd.f32 %v711_v36, %v703_v54  ;;  %v4032_v19 = vperm.slane %v2680_v8, 4  ;;  %v3964_v18 = vperm.slane %v2776_v16, 1 }
 0x16c   : > { %4030 = vst [vmem:[#allocation29_spill] sm:$0xff] %v2809_v30  ;;  %v779_v30 = vadd.f32 %v775_v10, %v767_v39  ;;  %v800_v6 = vmul.f32 %v2637_v33, %v2726_v45  ;;  %v723_v24 = vmul.f32 %v2594_v47, %v2726_v45  ;;  %v714_v41 = vadd.f32 %v710_v60, %v702_v48 }
 0x16d   : > { %v2828_v29 = vmul.f32 %v4032_v19, %v675_v23  ;;  %v722_v36 = vmul.f32 %v2594_v47, %v2817_v52  ;;  %v932_v39 = vadd.f32 %v2720_v31, %v920_v37  ;;  %v4033_v54 = vperm.slane %v2776_v16, 0 }
 0x16e   : > { %v650_v35 = vpop.permute.xlu0 %649  ;;  %v804_v19 = vadd.f32 %v800_v6, %v792_v49  ;;  %v727_v62 = vadd.f32 %v723_v24, %v715_v5  ;;  %v2851_v4 = vadd.f32 %v2714_v28, %v779_v30  ;;  %v940_v48 = vmul.f32 %v2657_v51, %v2817_v52 }
 0x16f   : > { %v604_v44 = vpop.permute.xlu1 %603  ;;  %v734_v31 = vmul.f32 %v2621_v12, %v2828_v29  ;;  %v2862_v60 = vmul.f32 %v2637_v33, %v2817_v52  ;;  %v726_v37 = vadd.f32 %v722_v36, %v714_v41  ;;  %v652_v49 = vsel %vm651_vm3, %v2690_v1, %v650_v35 }
 0x170   : > { %v611_v20 = vsel %vm609_vm1, %v2665_v57, %v604_v44  ;;  %v2844_v57 = vadd.f32 %v997_v46, %v989_v25  ;;  %v610_v14 = vsel %vm609_vm1, %v604_v44, %v2661_v53  ;;  %v4034_v25 = vperm.slane %v2789_v17, 1 }
 0x171   : > { %v2848_v23 = vmul.f32 %v4033_v54, %v611_v20  ;;  %v4035_v6 = vperm.slane %v2669_v59, 4  ;;  %v4036_v30 = vperm.slane %v2789_v17, 0  ;;  %v655_v1 = vsel %vm651_vm3, %v650_v35, %v2730_v26 }
 0x172   : > { %v4037_v26 = vperm.slane %v2776_v16, 3  ;;  %v2911_v41 = vadd.f32 %v940_v48, %v932_v39 }
 0x173   : > { %v769_v46 = vmul.f32 %v2647_v42, %v2848_v23  ;;  %v692_v20 = vmul.f32 %v2580_v63, %v2848_v23  ;;  %v910_v48 = vmul.f32 %v2651_v2, %v2848_v23 }
 0x174   : > { %v2909_v35 = vmul.f32 %v4037_v26, %v652_v49  ;;  %v3983_v26 = vperm.slane %v2789_v17, 4 }
 0x176   : > { %v669_v10 = vpop.permute.xlu0 %668 }
 0x177   : > { %v627_v27 = vpop.permute.xlu1 %626  ;;  %v674_v5 = vsel %vm672_vm4, %v2655_v50, %v669_v10  ;;  %v2890_v50 = vmul.f32 %v4036_v30, %v610_v14  ;;  %v4038_v30 = vperm.slane %v2789_v17, 3 }
 0x178   : > { %v631_v28 = vsel %vm630_vm2, %v627_v27, %v2667_v58  ;;  %v632_v44 = vsel %vm630_vm2, %v2678_v7, %v627_v27  ;;  %v2886_v7 = vmul.f32 %v4035_v6, %v674_v5 }
 0x179   : > { %v2878_v53 = vmul.f32 %v3964_v18, %v632_v44  ;;  %v2882_v58 = vmul.f32 %v4034_v25, %v631_v28  ;;  %v2919_v18 = vmul.f32 %v4038_v30, %v655_v1 }
 0x17a   : > { %v812_v27 = vmul.f32 %v2619_v11, %v2886_v7  ;;  %v735_v24 = vmul.f32 %v2621_v12, %v2886_v7 }
 0x17b   : > { %v777_v14 = vmul.f32 %v2629_v15, %v2878_v53  ;;  %v700_v36 = vmul.f32 %v2641_v0, %v2878_v53  ;;  %v918_v54 = vmul.f32 %v2643_v40, %v2878_v53  ;;  %v919_v28 = vmul.f32 %v2643_v40, %v2882_v58 }
 0x17c   : > { %v816_v44 = vadd.f32 %v812_v27, %v804_v19  ;;  %v739_v5 = vadd.f32 %v735_v24, %v727_v62  ;;  %v778_v49 = vmul.f32 %v2629_v15, %v2882_v58  ;;  %v701_v39 = vmul.f32 %v2641_v0, %v2882_v58  ;;  %v866_v0 = vpop.permute.xlu2 %865 }
 0x17d   : > { %v781_v25 = vadd.f32 %v777_v14, %v769_v46  ;;  %v704_v6 = vadd.f32 %v700_v36, %v692_v20  ;;  %v911_v15 = vmul.f32 %v2651_v2, %v2890_v50  ;;  %v770_v46 = vmul.f32 %v2647_v42, %v2890_v50 }
 0x17e   : > { %821 = vrot.lane.b32.xlu2 %v816_v44, %s2300_s29  ;;  %744 = vrot.lane.b32.xlu0 %v739_v5, %s2301_s23  ;;  %v693_v20 = vmul.f32 %v2580_v63, %v2890_v50  ;;  %v922_v27 = vadd.f32 %v918_v54, %v910_v48  ;;  %v4039_v24 = vperm.slane %v2776_v16, 4  ;;  %v724_v2 = vmul.f32 %v2594_v47, %v2909_v35 }
 0x17f   : > { %v671_v40 = vpop.permute.xlu1 %670  ;;  %v793_v62 = vadd.f32 %v2746_v3, %v781_v25  ;;  %v716_v19 = vadd.f32 %v2766_v21, %v704_v6  ;;  %v846_v3 = vpop.permute.xlu0 %845  ;;  %v801_v21 = vmul.f32 %v2637_v33, %v2909_v35  ;;  %v923_v36 = vadd.f32 %v919_v28, %v911_v15  ;;  %v4040_v15 = vld [vmem:[#allocation29_spill] sm:$0xff] }
 0x180   : > { %v673_v1 = vsel %vm672_vm4, %v669_v10, %v671_v40  ;;  %v676_v42 = vsel %vm672_vm4, %v671_v40, %v2728_v56  ;;  %v738_v10 = vadd.f32 %v734_v31, %v726_v37  ;;  %v782_v44 = vadd.f32 %v778_v49, %v770_v46 }
 0x181   : > { %v2942_v14 = vmul.f32 %v4039_v24, %v673_v1  ;;  %v705_v63 = vadd.f32 %v701_v39, %v693_v20  ;;  %v805_v54 = vadd.f32 %v801_v21, %v793_v62  ;;  %v728_v25 = vadd.f32 %v724_v2, %v716_v19  ;;  %v4041_v20 = vld [vmem:[#allocation25_spill] sm:$0xff] }
 0x182   : > { %v848_v30 = vmul.f32 %v846_v3, %v2738_v61  ;;  %v934_v48 = vadd.f32 %v2750_v34, %v922_v27  ;;  %v942_v28 = vmul.f32 %v2657_v51, %v2909_v35  ;;  %v943_v56 = vmul.f32 %v2657_v51, %v2919_v18 }
 0x183   : > { %v813_v5 = vmul.f32 %v2619_v11, %v2942_v14  ;;  %v736_v6 = vmul.f32 %v2621_v12, %v2942_v14  ;;  %v2963_v31 = vmul.f32 %v3983_v26, %v676_v42  ;;  %v935_v39 = vadd.f32 %v2770_v22, %v923_v36 }
 0x184   : > { %v849_v40 = vmul.f32 %v846_v3, %v2684_v9  ;;  %v850_v61 = vmul.f32 %v846_v3, %v2848_v23  ;;  %v851_v34 = vmul.f32 %v846_v3, %v2890_v50  ;;  %v946_v62 = vadd.f32 %v942_v28, %v934_v48  ;;  %v890_v36 = vpop.permute.xlu2 %889 }
 0x185   : > { %v817_v37 = vadd.f32 %v813_v5, %v805_v54  ;;  %v740_v49 = vadd.f32 %v736_v6, %v728_v25  ;;  %v794_v51 = vadd.f32 %v2758_v13, %v782_v44  ;;  %v717_v1 = vadd.f32 %v4040_v15, %v705_v63  ;;  %v4042_v5 = vld [vmem:[#allocation17_spill] sm:$0xff] }
 0x186   : > { %v2973_v46 = vadd.f32 %v943_v56, %v935_v39  ;;  %742 = vrot.lane.b32.xlu2 %v738_v10, %s2301_s23  ;;  %v802_v21 = vmul.f32 %v2637_v33, %v2919_v18  ;;  %v814_v13 = vmul.f32 %v2619_v11, %v2963_v31  ;;  %v725_v2 = vmul.f32 %v2594_v47, %v2919_v18  ;;  %v4043_v10 = vld [vmem:[#allocation18_spill] sm:$0xff]  ;;  %v4044_v33 = vld [vmem:[#allocation21_spill] sm:$0xff]  ;;  %v4045_v56 = vld [vmem:[#allocation20_spill] sm:$0xff] }
 0x187   : > { %v854_v19 = vpop.permute.xlu1 %853  ;;  %823 = vrot.lane.b32.xlu0 %v817_v37, %s2300_s29  ;;  %746 = vrot.lane.b32.xlu1 %v740_v49, %s2301_s23  ;;  %v868_v25 = vmul.f32 %v866_v0, %v4042_v5  ;;  %v869_v6 = vmul.f32 %v866_v0, %v4043_v10  ;;  %v952_v28 = vmul.f32 %v4044_v33, %v2828_v29  ;;  %v4046_v49 = vld [vmem:[#allocation19_spill] sm:$0xff] }
 0x188   : > { %v856_v22 = vmul.f32 %v854_v19, %v2734_v38  ;;  %v857_v27 = vmul.f32 %v854_v19, %v4041_v20  ;;  %v858_v24 = vmul.f32 %v854_v19, %v2878_v53  ;;  %v859_v3 = vmul.f32 %v854_v19, %v2882_v58 }
 0x189   : > { %v737_v38 = vmul.f32 %v2621_v12, %v2963_v31  ;;  %v806_v48 = vadd.f32 %v802_v21, %v794_v51  ;;  %v870_v37 = vmul.f32 %v866_v0, %v4045_v56  ;;  %v871_v47 = vmul.f32 %v866_v0, %v4046_v49 }
 0x18a   : > { %v860_v42 = vadd.f32 %v856_v22, %v848_v30  ;;  %v861_v44 = vadd.f32 %v857_v27, %v849_v40  ;;  %v862_v63 = vadd.f32 %v858_v24, %v850_v61  ;;  %v863_v54 = vadd.f32 %v859_v3, %v851_v34 }
 0x18b   : > { %v729_v39 = vadd.f32 %v725_v2, %v717_v1  ;;  %v811_v12 = vmul.f32 %v2619_v11, %v2828_v29  ;;  %v892_v30 = vmul.f32 %v890_v36, %v2828_v29  ;;  %v818_v40 = vadd.f32 %v814_v13, %v806_v48 }
 0x18c   : > { %v956_v61 = vadd.f32 %v952_v28, %v2911_v41  ;;  %v803_v34 = vadd.f32 %v2862_v60, %v2851_v4  ;;  %v992_v51 = vmul.f32 %v2649_v43, %v2890_v50  ;;  %v1000_v15 = vmul.f32 %v2634_v32, %v2882_v58 }
 0x18d   : > { %v741_v19 = vadd.f32 %v737_v38, %v729_v39  ;;  %v991_v0 = vmul.f32 %v2649_v43, %v2848_v23  ;;  %v954_v11 = vmul.f32 %v4044_v33, %v2942_v14  ;;  %v955_v4 = vmul.f32 %v4044_v33, %v2963_v31 }
 0x18e   : > { %v999_v60 = vmul.f32 %v2634_v32, %v2878_v53  ;;  %v872_v50 = vadd.f32 %v868_v25, %v860_v42  ;;  %v873_v41 = vadd.f32 %v869_v6, %v861_v44  ;;  %v874_v23 = vadd.f32 %v870_v37, %v862_v63  ;;  %v4047_v6 = vld [vmem:[#allocation24_spill] sm:$0xff] }
 0x18f   : > { %825 = vrot.lane.b32.xlu1 %v818_v40, %s2300_s29  ;;  %960 = vrot.lane.b32.xlu0 %v956_v61, %s2302_s30  ;;  %v875_v1 = vadd.f32 %v871_v47, %v863_v54  ;;  %v1004_v21 = vadd.f32 %v1000_v15, %v992_v51  ;;  %v895_v13 = vmul.f32 %v890_v36, %v2963_v31 }
 0x190   : > { %748 = vrot.lane.b32.xlu2 %v741_v19, %s2301_s23  ;;  %v878_v58 = vpop.permute.xlu1 %877  ;;  %v894_v53 = vmul.f32 %v890_v36, %v2942_v14  ;;  %v893_v2 = vmul.f32 %v890_v36, %v2886_v7  ;;  %v958_v54 = vadd.f32 %v954_v11, %v946_v62  ;;  %v815_v25 = vadd.f32 %v811_v12, %v803_v34  ;;  %v4048_v36 = vld [vmem:[#allocation23_spill] sm:$0xff]  ;;  %v4050_v12 = vld [vmem:[#allocation28_spill] sm:$0xff] }
 0x191   : > { %v880_v22 = vmul.f32 %v878_v58, %v2817_v52  ;;  %v881_v27 = vmul.f32 %v878_v58, %v2726_v45  ;;  %v882_v24 = vmul.f32 %v878_v58, %v2909_v35  ;;  %v883_v3 = vmul.f32 %v878_v58, %v2919_v18 }
 0x192   : > { %v1021_v48 = vmul.f32 %v4047_v6, %v2817_v52  ;;  %v1003_v28 = vadd.f32 %v999_v60, %v991_v0  ;;  %v1011_v61 = vmul.f32 %v4048_v36, %v4045_v56  ;;  %v959_v19 = vadd.f32 %v955_v4, %v2973_v46  ;;  %v4049_v52 = vld [vmem:[#allocation26_spill] sm:$0xff] }
 0x193   : > { %v884_v38 = vadd.f32 %v880_v22, %v872_v50  ;;  %v885_v42 = vadd.f32 %v881_v27, %v873_v41  ;;  %v886_v44 = vadd.f32 %v882_v24, %v874_v23  ;;  %v887_v63 = vadd.f32 %v883_v3, %v875_v1  ;;  %v4051_v46 = vld [vmem:[#allocation22_spill] sm:$0xff]  ;;  %v3069_v1 = vld [vmem:[%s3905_s5] sm:$0xf]  ;;  %v4052_v22 = vld [vmem:[#allocation27_spill] sm:$0xff] }
 0x194   : > { %v1013_v62 = vadd.f32 %v4049_v52, %v2844_v57  ;;  %v1016_v34 = vadd.f32 %v4050_v12, %v1004_v21  ;;  %v1015_v51 = vadd.f32 %v1011_v61, %v1003_v28  ;;  %v1024_v0 = vmul.f32 %v4047_v6, %v2919_v18  ;;  %v1066_v3 = vld [vmem:[%s3904_s4] sm:$0xf] }
 0x195   : > { %v3024_v37 = vadd.f32 %v895_v13, %v887_v63  ;;  %v3026_v47 = vadd.f32 %v894_v53, %v886_v44  ;;  %v3028_v39 = vadd.f32 %v892_v30, %v884_v38  ;;  %v3030_v40 = vadd.f32 %v893_v2, %v885_v42  ;;  %v3085_v63 = vld [vmem:[%s3907_s7] sm:$0xff] }
 0x196   : > { %v998_v30 = vmul.f32 %v2634_v32, %v4041_v20  ;;  %v1025_v15 = vadd.f32 %v1021_v48, %v1013_v62  ;;  %v1036_v11 = vmul.f32 %v4051_v46, %v2963_v31  ;;  %v990_v4 = vmul.f32 %v2649_v43, %v2684_v9 }
 0x197   : > { %964 = vrot.lane.b32.xlu1 %v958_v54, %s2302_s30  ;;  %819 = vrot.lane.b32.xlu0 %v815_v25, %s2300_s29  ;;  %v1023_v57 = vmul.f32 %v4047_v6, %v2909_v35  ;;  %v1035_v60 = vmul.f32 %v4051_v46, %v2942_v14  ;;  %v1033_v32 = vmul.f32 %v4051_v46, %v2828_v29  ;;  %v4053_v21 = vmov 5   ;;  %v3087_v54 = vld [vmem:[#allocation7 + $0x18] sm:$0x1f] }
 0x198   : > { %966 = vrot.lane.b32.xlu2 %v959_v19, %s2302_s30  ;;  %v1028_v20 = vadd.f32 %v1024_v0, %v1016_v34  ;;  %v1002_v58 = vadd.f32 %v998_v30, %v990_v4  ;;  %v1010_v18 = vmul.f32 %v4048_v36, %v4043_v10  ;;  %v953_v9 = vmul.f32 %v4044_v33, %v2886_v7  ;;  %v1302_v33 = vld [vmem:[%s3906_s6] sm:$0xff]  ;;  %v3096_v36 = vld [vmem:[#allocation7 + $0x10] sm:$0x1f] }
 0x199   : > { %v1027_v50 = vadd.f32 %v1023_v57, %v1015_v51  ;;  %v1037_v41 = vadd.f32 %v1033_v32, %v1025_v15  ;;  %v1022_v29 = vmul.f32 %v4047_v6, %v2726_v45  ;;  %v1034_v35 = vmul.f32 %v4051_v46, %v2886_v7  ;;  %4054 = vst [vmem:[#allocation29_spill] sm:$0xff] %v3087_v54 }
 0x19a   : > { %v1040_v31 = vadd.f32 %v1036_v11, %v1028_v20  ;;  %v1014_v43 = vadd.f32 %v1010_v18, %v1002_v58  ;;  %v957_v27 = vadd.f32 %v953_v9, %v4052_v22  ;;  %v1162_v45 = vunpack.c.l.b16 %v3069_v1  ;;  %4055 = vst [vmem:[#allocation25_spill] sm:$0xff] %v3096_v36 }
 0x19b   : > { %v1039_v23 = vadd.f32 %v1035_v60, %v1027_v50  ;;  %v3976_v25 = vperm.slane %v3087_v54, 1  ;;  %v3972_v19 = vperm.slane %v3087_v54, 0  ;;  %v3974_v62 = vperm.slane %v3096_v36, 0 }
 0x19c   : > { %v1026_v14 = vadd.f32 %v1022_v29, %v1014_v43  ;;  %v1163_v7 = vpack.c.b16 %v1162_v45, %v1162_v45  ;;  %v3977_v12 = vperm.slane %v3096_v36, 1  ;;  %v4056_v0 = vmov 15   ;;  %v3137_v43 = vld [vmem:[#allocation7 + $0x8] sm:$0x1f] }
 0x19d   : > { %v4057_v46 = vmov 20   ;;  %v4058_v20 = vmov 6   ;;  %v3969_v58 = vperm.slane %v3087_v54, 3  ;;  %v3970_v50 = vperm.slane %v3096_v36, 3  ;;  %4060 = vst [vmem:[#allocation18_spill] sm:$0xff] %v3137_v43 }
 0x19e   : > { %v1038_v24 = vadd.f32 %v1034_v35, %v1026_v14  ;;  %v3981_v14 = vperm.slane %v3137_v43, 1  ;;  %v3968_v22 = vperm.slane %v3096_v36, 4  ;;  %v3967_v45 = vperm.slane %v3087_v54, 4 }
 0x19f   : > { %1041 = vrot.lane.b32.xlu1 %v1037_v41, %s2303_s16  ;;  %1047 = vrot.lane.b32.xlu0 %v1040_v31, %s2303_s16 }
 0x1a0   : > { %1045 = vrot.lane.b32.xlu2 %v1039_v23, %s2303_s16  ;;  %v3135_v23 = vld [vmem:[#allocation7] sm:$0x1f] }
 0x1a1   : > { %4059 = vst [vmem:[#allocation17_spill] sm:$0xff] %v3135_v23  ;;  %v3979_v35 = vperm.slane %v3135_v23, 1 }
 0x1a7   : > { %962 = vrot.lane.b32.xlu1 %v957_v27, %s2302_s30  ;;  %1043 = vrot.lane.b32.xlu0 %v1038_v24, %s2303_s16 }
 0x1a8   : > { %1069 = vperm.xlu2 %2036, %v1066_v3  }
 0x1af   : > { %1164 = vrot.lane.b32.xlu1 %v1163_v7, %s2304_s27  ;;  %1399 = vperm.xlu0 %2039, %v3085_v63  }
 0x1b0   : > { %1305 = vperm.xlu2 %2036, %v1302_v33  }
 0x1b7   : > { %1379 = vperm.xlu1 %2037, %v3085_v63   ;;  %2043 = vset.pattern.permute.xlu0 %v4058_v20  ;;  %v3978_v20 = vperm.slane %v3137_v43, 3 }
 0x1b8   : > { %2038 = vset.pattern.permute.xlu2 %v4053_v21  ;;  %1459 = vperm.xlu0 %2043, %v3085_v63   ;;  %v3982_v21 = vperm.slane %v3137_v43, 0 }
 0x1b9   : > { %1387 = vperm.xlu2 %2038, %v3085_v63  }
 0x1bf   : > { %2040 = vset.pattern.permute.xlu1 %v4056_v0 }
 0x1c0   : > { %1411 = vperm.xlu1 %2040, %v3085_v63  }
 0x1c1   : > { %2041 = vset.pattern.permute.xlu2 %v4057_v46 }
 0x1c2   : > { %1423 = vperm.xlu2 %2041, %v3085_v63  }
 0x1d8   : > { %v822_v13 = vpop.permute.xlu2 %821 }
 0x1e0   : > { %v743_v53 = vpop.permute.xlu2 %742 }
 0x1ea   : > { %v749_v38 = vpop.permute.xlu2 %748 }
 0x1eb   : > { %v754_v7 = vsel %vm750_vm6, %v749_v38, %v743_v53 }
 0x1f0   : > { %v745_v2 = vpop.permute.xlu0 %744 }
 0x1f2   : > { %v967_v28 = vpop.permute.xlu2 %966 }
 0x1f9   : > { %v747_v42 = vpop.permute.xlu1 %746  ;;  %v824_v44 = vpop.permute.xlu0 %823 }
 0x1fa   : > { %v751_v52 = vsel %vm750_vm6, %v747_v42, %v749_v38  ;;  %v752_v30 = vsel %vm750_vm6, %v745_v2, %v747_v42  ;;  %v829_v51 = vsel %vm827_vm5, %v822_v13, %v824_v44  ;;  %v1046_v18 = vpop.permute.xlu2 %1045  ;;  %v753_v42 = vsel %vm750_vm6, %v743_v53, %v745_v2 }
 0x1fb   : > { %v762_v15 = vmul.f32 %v3972_v19, %v751_v52  ;;  %v761_v11 = vmul.f32 %v3974_v62, %v752_v30  ;;  %v838_v4 = vmul.f32 %v3977_v12, %v829_v51  ;;  %v4061_v52 = vmov 11  }
 0x1fc   : > { %2044 = vset.pattern.permute.xlu1 %v4061_v52 }
 0x1fd   : > { %v842_v9 = vadd.f32 %v838_v4, %v761_v11  ;;  %1471 = vperm.xlu1 %2044, %v3085_v63   ;;  %v760_v11 = vmul.f32 %v3982_v21, %v753_v42 }
 0x201   : > { %v826_v6 = vpop.permute.xlu1 %825  ;;  %v3093_v48 = vpop.permute.xlu0 %960 }
 0x202   : > { %v828_v61 = vsel %vm827_vm5, %v824_v44, %v826_v6  ;;  %v972_v41 = vsel %vm3966_vm7, %v967_v28, %v3093_v48  ;;  %v1070_v0 = vpop.permute.xlu2 %1069 }
 0x203   : > { %v839_v34 = vmul.f32 %v3976_v25, %v828_v61  ;;  %v980_v27 = vmul.f32 %v3969_v58, %v972_v41 }
 0x205   : > { %v843_v57 = vadd.f32 %v839_v34, %v762_v15  ;;  %v4062_v34 = vmov 1   ;;  %v4063_v15 = vmov 2  }
 0x206   : > { %2042 = vset.pattern.permute.xlu2 %v4062_v34  ;;  %2047 = vset.pattern.permute.xlu0 %v4063_v15  ;;  %v4064_v34 = vmov 21  }
 0x207   : > { %v903_v29 = vadd.f32 %v3024_v37, %v843_v57  ;;  %v3980_v37 = vperm.slane %v3135_v23, 0  ;;  %1451 = vperm.xlu2 %2042, %v3085_v63   ;;  %1527 = vperm.xlu0 %2047, %v3085_v63  }
 0x208   : > { %2046 = vset.pattern.permute.xlu1 %v4064_v34 }
 0x209   : > { %v3121_v60 = vpop.permute.xlu1 %964  ;;  %v820_v32 = vpop.permute.xlu0 %819  ;;  %v984_v44 = vadd.f32 %v980_v27, %v903_v29  ;;  %v759_v46 = vmul.f32 %v3980_v37, %v754_v7  ;;  %v3971_v27 = vperm.slane %v3135_v23, 4  ;;  %1495 = vperm.xlu1 %2046, %v3085_v63  }
 0x20a   : > { %v969_v31 = vsel %vm3966_vm7, %v3121_v60, %v967_v28  ;;  %v831_v3 = vsel %vm827_vm5, %v826_v6, %v820_v32  ;;  %v830_v33 = vsel %vm827_vm5, %v820_v32, %v822_v13  ;;  %v902_v28 = vadd.f32 %v3026_v47, %v842_v9 }
 0x20b   : > { %v979_v24 = vmul.f32 %v3970_v50, %v969_v31  ;;  %v836_v38 = vmul.f32 %v3979_v35, %v831_v3  ;;  %v837_v53 = vmul.f32 %v3981_v14, %v830_v33  ;;  %v3973_v32 = vperm.slane %v3135_v23, 3 }
 0x20c   : > { %v3975_v3 = vperm.slane %v3137_v43, 4  ;;  %v4099_v43 = vperm.slane %v2680_v8, 3 }
 0x20d   : > { %v983_v47 = vadd.f32 %v979_v24, %v902_v28  ;;  %v840_v41 = vadd.f32 %v836_v38, %v759_v46  ;;  %v841_v31 = vadd.f32 %v837_v53, %v760_v11  ;;  %v4066_v53 = vmov 8  }
 0x20f   : > { %v900_v38 = vadd.f32 %v3028_v39, %v840_v41  ;;  %2052 = vset.pattern.permute.xlu0 %v4066_v53  ;;  %v4067_v41 = vmov 7  }
 0x210   : > { %1595 = vperm.xlu0 %2052, %v3085_v63  }
 0x211   : > { %v1042_v61 = vpop.permute.xlu1 %1041  ;;  %v1048_v6 = vpop.permute.xlu0 %1047  ;;  %2048 = vset.pattern.permute.xlu1 %v4067_v41 }
 0x212   : > { %v1050_v13 = vsel %vm3965_vm8, %v1046_v18, %v1048_v6  ;;  %v1053_v30 = vsel %vm3965_vm8, %v1048_v6, %v1042_v61  ;;  %1535 = vperm.xlu1 %2048, %v3085_v63  }
 0x213   : > { %v1060_v2 = vmul.f32 %v3968_v22, %v1050_v13  ;;  %v1061_v51 = vmul.f32 %v3967_v45, %v1053_v30  ;;  %v901_v13 = vadd.f32 %v3030_v40, %v841_v31 }
 0x215   : > { %v1064_v4 = vadd.f32 %v1060_v2, %v983_v47  ;;  %v1065_v57 = vadd.f32 %v1061_v51, %v984_v44 }
 0x217   : > { %v3184_v9 = vadd.f32 %v1070_v0, %v1064_v4  ;;  %v3186_v29 = vadd.f32 %v1070_v0, %v1065_v57 }
 0x219   : > { %v963_v24 = vpop.permute.xlu1 %962  ;;  %v1044_v7 = vpop.permute.xlu0 %1043  ;;  %v1078_v33 = vsub.f32 0.0, %v3184_v9  ;;  %v1079_v42 = vsub.f32 0.0, %v3186_v29 }
 0x21a   : > { %v970_v44 = vsel %vm3966_vm7, %v963_v24, %v3121_v60  ;;  %v971_v28 = vsel %vm3966_vm7, %v3093_v48, %v963_v24  ;;  %v1051_v6 = vsel %vm3965_vm8, %v1044_v7, %v1046_v18  ;;  %v1052_v52 = vsel %vm3965_vm8, %v1042_v61, %v1044_v7 }
 0x21b   : > { %v977_v30 = vmul.f32 %v3973_v32, %v971_v28  ;;  %v978_v60 = vmul.f32 %v3978_v20, %v970_v44  ;;  %v1058_v48 = vmul.f32 %v3971_v27, %v1052_v52  ;;  %v1084_v18 = vmul.f32 1.442695, %v1078_v33 }
 0x21c   : > { %v1086_v47 = vmul.f32 1.442695, %v1079_v42  ;;  %v4065_v61 = vmov 16   ;;  %v1059_v40 = vmul.f32 %v3975_v3, %v1051_v6  ;;  %v4068_v42 = vmov 12  }
 0x21d   : > { %2045 = vset.pattern.permute.xlu2 %v4065_v61  ;;  %v981_v39 = vadd.f32 %v977_v30, %v900_v38  ;;  %v982_v2 = vadd.f32 %v978_v60, %v901_v13  ;;  %2080 = vpow2.f32 %v1084_v18  ;;  %v4069_v44 = vmov 14  }
 0x21e   : > { %1483 = vperm.xlu2 %2045, %v3085_v63   ;;  %2082 = vpow2.f32 %v1086_v47  ;;  %2057 = vset.pattern.permute.xlu0 %v4069_v44  ;;  %v4071_v13 = vmov 3  }
 0x21f   : > { %v1062_v51 = vadd.f32 %v1058_v48, %v981_v39  ;;  %v1063_v15 = vadd.f32 %v1059_v40, %v982_v2 }
 0x221   : > { %v3218_v46 = vadd.f32 %v1070_v0, %v1062_v51  ;;  %v3220_v11 = vadd.f32 %v1070_v0, %v1063_v15  ;;  %v4070_v0 = vmov 17  }
 0x222   : > { %2050 = vset.pattern.permute.xlu1 %v4070_v0  ;;  %v1155_v0 = vpack.c.bf16 %v4045_v56, %v4045_v56 }
 0x223   : > { %v1076_v4 = vsub.f32 0.0, %v3218_v46  ;;  %v1077_v57 = vsub.f32 0.0, %v3220_v11  ;;  %v2081_v31 = vpop.eup %2080  ;;  %1559 = vperm.xlu1 %2050, %v3085_v63  }
 0x224   : > { %v2083_v24 = vpop.eup %2082  ;;  %v1090_v7 = vadd.f32 1.0, %v2081_v31 }
 0x225   : > { %v1080_v33 = vmul.f32 1.442695, %v1076_v4  ;;  %v1091_v28 = vadd.f32 1.0, %v2083_v24  ;;  %v1082_v6 = vmul.f32 1.442695, %v1077_v57  ;;  %v4072_v24 = vmov 13  }
 0x226   : > { %2049 = vset.pattern.permute.xlu2 %v4068_v42  ;;  %2084 = vrcp.f32 %v1090_v7  ;;  %v1129_v61 = vand.u32 2147483647, %v1090_v7  ;;  %v1131_v53 = vand.u32 2147483648, %v1090_v7  ;;  %vm1125_vm11 = vweird.f32 %v1090_v7 }
 0x227   : > { %1547 = vperm.xlu2 %2049, %v3085_v63   ;;  %2086 = vrcp.f32 %v1091_v28  ;;  %v1145_v51 = vand.u32 2147483648, %v1091_v28  ;;  %v1143_v4 = vand.u32 2147483647, %v1091_v28  ;;  %vm1139_vm13 = vweird.f32 %v1091_v28 }
 0x228   : > { %2088 = vpow2.f32 %v1080_v33  ;;  %v1132_v41 = vor.u32 1.1754944e-38, %v1131_v53  ;;  %vm1130_vm14 = vcmp.eq.f32.partialorder %v1129_v61, 8.507059e+37 }
 0x229   : > { %2090 = vpow2.f32 %v1082_v6  ;;  %v1146_v42 = vor.u32 1.1754944e-38, %v1145_v51  ;;  %vm1144_vm0 = vcmp.eq.f32.partialorder %v1143_v4, 8.507059e+37 }
 0x22b   : > { %2053 = vset.pattern.permute.xlu1 %v4072_v24 }
 0x22c   : > { %v2085_v52 = vpop.eup %2084  ;;  %1607 = vperm.xlu1 %2053, %v3085_v63  }
 0x22d   : > { %v2087_v34 = vpop.eup %2086  ;;  %v1121_v38 = vmul.f32 %v2085_v52, %v1090_v7  ;;  %vm1126_vm9 = vweird.f32 %v2085_v52 }
 0x22e   : > { %v2089_v30 = vpop.eup %2088  ;;  %v1135_v60 = vmul.f32 %v2087_v34, %v1091_v28  ;;  %vm1140_vm10 = vweird.f32 %v2087_v34  ;;  %vm1127_vm12 = vmor %vm1125_vm11, %vm1126_vm9  ;;  %vm1170_vm9 = vcmask 1041408  }
 0x22f   : > { %2051 = vset.pattern.permute.xlu2 %v4071_v13  ;;  %v2091_v48 = vpop.eup %2090  ;;  %v1122_v18 = vsub.f32 1.0, %v1121_v38  ;;  %v3233_v47 = vadd.f32 1.0, %v2089_v30  ;;  %vm1141_vm15 = vmor %vm1139_vm13, %vm1140_vm10  ;;  %v4073_v38 = vmov 4   ;;  %v1245_v61 = vsel %vm1170_vm9, %v1155_v0, 0 }
 0x230   : > { %1587 = vperm.xlu2 %2051, %v3085_v63   ;;  %v1136_v39 = vsub.f32 1.0, %v1135_v60  ;;  %v3235_v2 = vadd.f32 1.0, %v2091_v48  ;;  %vm1166_vm10 = vcmask 31744  }
 0x231   : > { %v1123_v40 = vmul.f32 %v2085_v52, %v1122_v18  ;;  %2092 = vrcp.f32 %v3233_v47  ;;  %vm1097_vm13 = vweird.f32 %v3233_v47 }
 0x232   : > { %v1137_v15 = vmul.f32 %v2087_v34, %v1136_v39  ;;  %2094 = vrcp.f32 %v3235_v2  ;;  %v1101_v39 = vand.u32 2147483647, %v3233_v47 }
 0x233   : > { %v1124_v57 = vadd.f32 %v2085_v52, %v1123_v40 }
 0x234   : > { %v1138_v31 = vadd.f32 %v2087_v34, %v1137_v15  ;;  %v1165_v15 = vpop.permute.xlu1 %1164 }
 0x235   : > { %v1128_v33 = vsel %vm1127_vm12, %v2085_v52, %v1124_v57 }
 0x236   : > { %v1133_v44 = vsel %vm1130_vm14, %v1132_v41, %v1128_v33  ;;  %v1142_v6 = vsel %vm1141_vm15, %v2087_v34, %v1138_v31  ;;  %v1156_v34 = vpack.c.bf16 %v4046_v49, %v4046_v49  ;;  %v1117_v49 = vand.u32 2147483648, %v3235_v2 }
 0x237   : > { %v2093_v7 = vpop.eup %2092  ;;  %v1150_v13 = vmul.f32 %v1133_v44, %v3184_v9  ;;  %v1147_v28 = vsel %vm1144_vm0, %v1146_v42, %v1142_v6  ;;  %v1115_v31 = vand.u32 2147483647, %v3235_v2  ;;  %v4074_v33 = vmov 9  }
 0x238   : > { %2054 = vset.pattern.permute.xlu2 %v4073_v38  ;;  %v2095_v52 = vpop.eup %2094  ;;  %v1151_v30 = vmul.f32 %v1147_v28, %v3186_v29  ;;  %v1093_v60 = vmul.f32 %v2093_v7, %v3233_v47  ;;  %v1103_v29 = vand.u32 2147483648, %v3233_v47  ;;  %vm1098_vm11 = vweird.f32 %v2093_v7  ;;  %2055 = vset.pattern.permute.xlu1 %v4074_v33 }
 0x239   : > { %1663 = vperm.xlu2 %2054, %v3085_v63   ;;  %v1159_v48 = vpack.c.bf16 %v1150_v13, %v1150_v13  ;;  %v1107_v56 = vmul.f32 %v2095_v52, %v3235_v2  ;;  %v1248_v57 = vsel %vm1170_vm9, %v1156_v34, 0  ;;  %vm1112_vm12 = vweird.f32 %v2095_v52  ;;  %vm1099_vm14 = vmor %vm1097_vm13, %vm1098_vm11  ;;  %1671 = vperm.xlu1 %2055, %v3085_v63  }
 0x23a   : > { %v1160_v18 = vpack.c.bf16 %v1151_v30, %v1151_v30  ;;  %v1094_v9 = vsub.f32 1.0, %v1093_v60  ;;  %v1104_v42 = vor.u32 1.1754944e-38, %v1103_v29  ;;  %vm1111_vm15 = vweird.f32 %v3235_v2 }
 0x23b   : > { %v1178_v53 = vsel %vm1170_vm9, %v1159_v48, 0  ;;  %v1108_v40 = vsub.f32 1.0, %v1107_v56  ;;  %v4075_v6 = vmov 18   ;;  %vm1102_vm0 = vcmp.eq.f32.partialorder %v1101_v39, 8.507059e+37  ;;  %vm1113_vm8 = vmor %vm1111_vm15, %vm1112_vm12 }
 0x23c   : > { %1216 = vmatpush.bf16.msrb.mxu2 %v1178_v53  ;;  %v1181_v51 = vsel %vm1170_vm9, %v1160_v18, 0  ;;  %v1095_v4 = vmul.f32 %v2093_v7, %v1094_v9  ;;  %v1118_v38 = vor.u32 1.1754944e-38, %v1117_v49  ;;  %vm1116_vm7 = vcmp.eq.f32.partialorder %v1115_v31, 8.507059e+37 }
 0x23d   : > { %1229 = vmatpush.bf16.msrb.mxu3 %v1181_v51  ;;  %v1109_v41 = vmul.f32 %v2095_v52, %v1108_v40  ;;  %v1153_v60 = vpack.c.bf16 %v4042_v5, %v4042_v5  ;;  %v1154_v48 = vpack.c.bf16 %v4043_v10, %v4043_v10  ;;  %v4077_v5 = vmov 19  }
 0x23e   : > { %v1096_v24 = vadd.f32 %v2093_v7, %v1095_v4 }
 0x23f   : > { %1891 = vmatmul.msk.bf16.vlgmr.msrb.gmra.mxu2 %vm1166_vm10, %v1165_v15  ;;  %v1110_v44 = vadd.f32 %v2095_v52, %v1109_v41  ;;  %v1239_v18 = vsel %vm1170_vm9, %v1153_v60, 0  ;;  %v2098_v60 = vld [vmem:[%s2473_s22] sm:$0xff] }
 0x240   : > { %1283 = vmatpush.bf16.msra.mxu2 %v1245_v61  ;;  %1892 = vmatmul.msk.bf16.vlgmr.msrb.gmra.mxu3 %vm1166_vm10, %v1165_v15  ;;  %v1100_v0 = vsel %vm1099_vm14, %v2093_v7, %v1096_v24 }
 0x241   : > { %1296 = vmatpush.bf16.msra.mxu3 %v1248_v57  ;;  %2056 = vset.pattern.permute.xlu2 %v4075_v6  ;;  %v1105_v47 = vsel %vm1102_vm0, %v1104_v42, %v1100_v0  ;;  %v1114_v13 = vsel %vm1113_vm8, %v2095_v52, %v1110_v44  ;;  %v1306_v57 = vpop.permute.xlu2 %1305  ;;  %v2097_v44 = vld [vmem:[%s2473_s22 + $0x18] sm:$0xff] }
 0x242   : > { %1619 = vperm.xlu2 %2056, %v3085_v63   ;;  %v1148_v28 = vmul.f32 %v1105_v47, %v3218_v46  ;;  %v1119_v30 = vsel %vm1116_vm7, %v1118_v38, %v1114_v13  ;;  %v1242_v46 = vsel %vm1170_vm9, %v1154_v48, 0  ;;  %v2099_v48 = vld [vmem:[%s2473_s22 + $0x8] sm:$0xff] }
 0x243   : > { %v1149_v2 = vmul.f32 %v1119_v30, %v3220_v11  ;;  %v4076_v11 = vmov 23  }
 0x244   : > { %v1157_v7 = vpack.c.bf16 %v1148_v28, %v1148_v28  ;;  %2058 = vset.pattern.permute.xlu1 %v4076_v11 }
 0x245   : > { %v1158_v34 = vpack.c.bf16 %v1149_v2, %v1149_v2 }
 0x246   : > { %v1172_v56 = vsel %vm1170_vm9, %v1157_v7, 0 }
 0x247   : > { %1190 = vmatpush.bf16.msrb.mxu0 %v1172_v56  ;;  %v1175_v52 = vsel %vm1170_vm9, %v1158_v34, 0 }
 0x248   : > { %1203 = vmatpush.bf16.msrb.mxu1 %v1175_v52 }
 0x24a   : > { %1889 = vmatmul.msk.bf16.vlgmr.msrb.gmra.mxu0 %vm1166_vm10, %v1165_v15  ;;  %2059 = vset.pattern.permute.xlu2 %v4077_v5  ;;  %v3350_v5 = vpop.permute.xlu1 %1379 }
 0x24b   : > { %1257 = vmatpush.bf16.msra.mxu0 %v1239_v18  ;;  %1890 = vmatmul.msk.bf16.vlgmr.msrb.gmra.mxu1 %vm1166_vm10, %v1165_v15  ;;  %v3326_v18 = vpop.permute.xlu2 %1387 }
 0x24c   : > { %1270 = vmatpush.bf16.msra.mxu1 %v1242_v46 }
 0x24f   : > { %1895 = vmatmul.msk.bf16.vlgmr.msra.gmra.mxu2 %vm1166_vm10, %v3069_v1 }
 0x250   : > { %1896 = vmatmul.msk.bf16.vlgmr.msra.gmra.mxu3 %vm1166_vm10, %v3069_v1 }
 0x253   : > { %v3334_v46 = vpop.permute.xlu2 %1423 }
 0x25a   : > { %1893 = vmatmul.msk.bf16.vlgmr.msra.gmra.mxu0 %vm1166_vm10, %v3069_v1 }
 0x25b   : > { %1894 = vmatmul.msk.bf16.vlgmr.msra.gmra.mxu1 %vm1166_vm10, %v3069_v1  ;;  %v2096_v1 = vld [vmem:[%s2473_s22 + $0x10] sm:$0xff] }
 0x261   : > { %v3344_v11 = vpop.permute.xlu2 %1451 }
 0x2c2   : > { %v1218_v10 = vpop.f32.mrf.mxu2 }
 0x2c3   : > { %v1231_v61 = vpop.f32.mrf.mxu3 }
 0x2c7   : > { %v1192_v9 = vpop.f32.mrf.mxu0 }
 0x2c8   : > { %v1205_v53 = vpop.f32.mrf.mxu1 }
 0x2ca   : > { %v1220_v39 = vpop.f32.mrf.mxu2 }
 0x2cb   : > { %v1233_v29 = vpop.f32.mrf.mxu3 }
 0x2cc   : > { %v4083_v29 = vmov 0  }
 0x2cf   : > { %v1194_v40 = vpop.f32.mrf.mxu0 }
 0x2d0   : > { %v1207_v51 = vpop.f32.mrf.mxu1 }
 0x2d2   : > { %v1285_v15 = vpop.f32.mrf.mxu2 }
 0x2d3   : > { %v1286_v4 = vadd.f32 %v1285_v15, %v1218_v10  ;;  %v1298_v49 = vpop.f32.mrf.mxu3  ;;  %v3356_v10 = vpop.permute.xlu2 %1483 }
 0x2d4   : > { %v1299_v41 = vadd.f32 %v1298_v49, %v1231_v61  ;;  %v3358_v61 = vpop.permute.xlu1 %1411  ;;  %v1400_v49 = vpop.permute.xlu0 %1399 }
 0x2d5   : > { %v3290_v31 = vadd.f32 %v1306_v57, %v1286_v4 }
 0x2d6   : > { %v3292_v24 = vadd.f32 %v1306_v57, %v1299_v41 }
 0x2d7   : > { %4078 = vst [vmem:[#allocation21_spill] sm:$0xff] %v3290_v31  ;;  %v1750_v33 = vadd.f32 %v2096_v1, %v3290_v31  ;;  %v1259_v42 = vpop.f32.mrf.mxu0 }
 0x2d8   : > { %4079 = vst [vmem:[#allocation20_spill] sm:$0xff] %v3292_v24  ;;  %v1751_v6 = vadd.f32 %v2097_v44, %v3292_v24  ;;  %v1260_v0 = vadd.f32 %v1259_v42, %v1192_v9  ;;  %v1272_v38 = vpop.f32.mrf.mxu1  ;;  %v4081_v9 = vmov 22   ;;  %v3436_v3 = vmul.f32 %v1400_v49, %v3292_v24 }
 0x2d9   : > { %v1273_v47 = vadd.f32 %v1272_v38, %v1205_v53  ;;  %1754 = vst [vmem:[%s3300_s28 + $0x10] sm:$0xff] %v1750_v33  ;;  %v4082_v53 = vmov 24  }
 0x2da   : > { %v3303_v13 = vadd.f32 %v1306_v57, %v1260_v0  ;;  %v1287_v28 = vpop.f32.mrf.mxu2  ;;  %1755 = vst [vmem:[%s3300_s28 + $0x18] sm:$0xff] %v1751_v6 }
 0x2db   : > { %v3306_v30 = vadd.f32 %v1306_v57, %v1273_v47  ;;  %v1300_v2 = vpop.f32.mrf.mxu3  ;;  %v1548_v39 = vpop.permute.xlu2 %1547  ;;  %4092 = vst [vmem:[#allocation30_spill] sm:$0xff] %v3436_v3 }
 0x2dc   : > { %4080 = vst [vmem:[#allocation19_spill] sm:$0xff] %v3303_v13  ;;  %v1748_v7 = vadd.f32 %v2098_v60, %v3303_v13  ;;  %1313 = vrot.lane.b32.xlu0 %v3303_v13, %s2292_s26  ;;  %v3366_v40 = vpop.permute.xlu1 %1471  ;;  %v3379_v1 = vpop.permute.xlu0 %1459  ;;  %v3433_v62 = vmul.f32 %v1548_v39, %v3290_v31  ;;  %v1550_v25 = vmul.f32 %v1548_v39, %v3303_v13 }
 0x2dd   : > { %v1749_v34 = vadd.f32 %v2099_v48, %v3306_v30  ;;  %1331 = vrot.lane.b32.xlu2 %v3306_v30, %s2291_s9  ;;  %1315 = vrot.lane.b32.xlu1 %v3306_v30, %s2292_s26  ;;  %v3459_v37 = vmul.f32 %v1400_v49, %v3303_v13 }
 0x2de   : > { %1752 = vst [vmem:[%s3300_s28] sm:$0xff] %v1748_v7 }
 0x2df   : > { %v1261_v56 = vpop.f32.mrf.mxu0  ;;  %1753 = vst [vmem:[%s3300_s28 + $0x8] sm:$0xff] %v1749_v34  ;;  %v4086_v34 = vperm.slane %v2669_v59, 0 }
 0x2e0   : > { %v1274_v52 = vpop.f32.mrf.mxu1  ;;  %4091 = vst [vmem:[#allocation27_spill] sm:$0xff] %v3433_v62 }
 0x2e3   : > { %v3369_v51 = vpop.permute.xlu2 %1587 }
 0x2e4   : > { %1347 = vrot.lane.b32.xlu0 %v3306_v30, %s2296_s17  ;;  %v3371_v15 = vpop.permute.xlu1 %1495  ;;  %v3385_v42 = vpop.permute.xlu0 %1527 }
 0x2e5   : > { %1345 = vrot.lane.b32.xlu2 %v3303_v13, %s2296_s17  ;;  %1329 = vrot.lane.b32.xlu1 %v3303_v13, %s2291_s9 }
 0x2eb   : > { %v3373_v4 = vpop.permute.xlu2 %1663 }
 0x2ec   : > { %1361 = vrot.lane.b32.xlu0 %v3303_v13, %s2295_s14  ;;  %v3375_v57 = vpop.permute.xlu1 %1535  ;;  %v3389_v0 = vpop.permute.xlu0 %1595 }
 0x2ed   : > { %1317 = vrot.lane.b32.xlu2 %v3290_v31, %s2292_s26  ;;  %1363 = vrot.lane.b32.xlu1 %v3306_v30, %s2295_s14  ;;  %4084 = vst [vmem:[#allocation24_spill] sm:$0xff] %v3375_v57 }
 0x2f3   : > { %v3377_v41 = vpop.permute.xlu2 %1619 }
 0x2f4   : > { %1319 = vrot.lane.b32.xlu0 %v3292_v24, %s2292_s26 }
 0x2f5   : > { %1351 = vrot.lane.b32.xlu2 %v3292_v24, %s2296_s17  ;;  %1335 = vrot.lane.b32.xlu1 %v3292_v24, %s2291_s9 }
 0x2fc   : > { %1333 = vrot.lane.b32.xlu0 %v3290_v31, %s2291_s9 }
 0x2fd   : > { %1365 = vrot.lane.b32.xlu2 %v3290_v31, %s2295_s14  ;;  %1349 = vrot.lane.b32.xlu1 %v3290_v31, %s2296_s17 }
 0x304   : > { %1367 = vrot.lane.b32.xlu0 %v3292_v24, %s2295_s14  ;;  %s1903_s14 = sshll.u32 %s2388_s21, 5 }
 0x305   : > { %1695 = vperm.xlu2 %2059, %v3085_v63   ;;  %1631 = vperm.xlu1 %2058, %v3085_v63  }
 0x30c   : > { %1683 = vperm.xlu0 %2057, %v3085_v63  }
 0x30d   : > { %2061 = vset.pattern.permute.xlu2 %v4081_v9  ;;  %2060 = vset.pattern.permute.xlu1 %v4082_v53  ;;  %v4087_v53 = vperm.slane %v2669_v59, 1 }
 0x30e   : > { %1571 = vperm.xlu2 %2061, %v3085_v63   ;;  %1707 = vperm.xlu1 %2060, %v3085_v63   ;;  %v3381_v63 = vpop.permute.xlu1 %1559 }
 0x314   : > { %2063 = vset.pattern.permute.xlu0 %v4083_v29 }
 0x316   : > { %2062 = vset.pattern.permute.xlu2 %v4083_v29  ;;  %v3387_v44 = vpop.permute.xlu1 %1607 }
 0x317   : > { %4085 = vst [vmem:[#allocation23_spill] sm:$0xff] %v3387_v44  ;;  %v3472_v54 = vmul.f32 %v3387_v44, %v3303_v13  ;;  %v1611_v62 = vmul.f32 %v3387_v44, %v3306_v30 }
 0x319   : > { %4097 = vst [vmem:[#allocation34_spill] sm:$0xff] %v3472_v54 }
 0x31e   : > { %v3391_v38 = vpop.permute.xlu1 %1671 }
 0x337   : > { %v3383_v33 = vpop.permute.xlu2 %1331 }
 0x33f   : > { %v1346_v6 = vpop.permute.xlu2 %1345 }
 0x347   : > { %v3393_v47 = vpop.permute.xlu2 %1317 }
 0x34e   : > { %v1314_v28 = vpop.permute.xlu0 %1313 }
 0x34f   : > { %v1316_v2 = vpop.permute.xlu1 %1315  ;;  %v3395_v60 = vpop.permute.xlu2 %1351 }
 0x350   : > { %v1323_v7 = vsel %vm609_vm1, %v1314_v28, %v1316_v2  ;;  %v1322_v14 = vsel %vm609_vm1, %v1316_v2, %v3393_v47  ;;  %v1475_v2 = vmul.f32 %v3366_v40, %v3306_v30 }
 0x351   : > { %v3403_v56 = vmul.f32 %v1323_v7, %v4086_v34  ;;  %v1551_v7 = vmul.f32 %v1548_v39, %v3306_v30 }
 0x353   : > { %v1531_v22 = vmul.f32 %v3385_v42, %v3403_v56 }
 0x356   : > { %v3399_v48 = vpop.permute.xlu0 %1347 }
 0x357   : > { %v1330_v52 = vpop.permute.xlu1 %1329  ;;  %v3412_v45 = vpop.permute.xlu2 %1365  ;;  %v1355_v12 = vsel %vm651_vm3, %v1346_v6, %v3399_v48 }
 0x358   : > { %v1339_v9 = vsel %vm630_vm2, %v1330_v52, %v3383_v33 }
 0x359   : > { %v3410_v29 = vmul.f32 %v1339_v9, %v4087_v53  ;;  %v3427_v9 = vmul.f32 %v3387_v44, %v3292_v24  ;;  %v3430_v53 = vmul.f32 %v1400_v49, %v3290_v31 }
 0x35b   : > { %v1539_v58 = vmul.f32 %v3375_v57, %v3410_v29  ;;  %4090 = vst [vmem:[#allocation22_spill] sm:$0xff] %v3427_v9  ;;  %v1463_v23 = vmul.f32 %v3379_v1, %v3410_v29  ;;  %v4101_v9 = vperm.slane %v2789_v17, 3 }
 0x35d   : > { %v1543_v34 = vadd.f32 %v1539_v58, %v1531_v22  ;;  %v3439_v58 = vmul.f32 %v1548_v39, %v3292_v24  ;;  %v4096_v39 = vperm.slane %v2680_v8, 0 }
 0x35e   : > { %v3419_v50 = vpop.permute.xlu0 %1361 }
 0x35f   : > { %v1364_v27 = vpop.permute.xlu1 %1363  ;;  %v3421_v19 = vadd.f32 %v1551_v7, %v1543_v34  ;;  %v3423_v32 = vpop.permute.xlu2 %1695  ;;  %4093 = vst [vmem:[#allocation31_spill] sm:$0xff] %v3439_v58  ;;  %v3445_v7 = vmul.f32 %v3366_v40, %v3290_v31  ;;  %v3449_v34 = vmul.f32 %v3366_v40, %v3292_v24  ;;  %v1391_v24 = vmul.f32 %v3326_v18, %v3410_v29 }
 0x360   : > { %4089 = vst [vmem:[#allocation28_spill] sm:$0xff] %v3423_v32  ;;  %v1371_v31 = vsel %vm672_vm4, %v3419_v50, %v1364_v27 }
 0x361   : > { %4088 = vst [vmem:[#allocation26_spill] sm:$0xff] %v3421_v19  ;;  %v3518_v19 = vmul.f32 %v3366_v40, %v3303_v13 }
 0x362   : > { %4094 = vst [vmem:[#allocation32_spill] sm:$0xff] %v3445_v7  ;;  %v1370_v7 = vsel %vm672_vm4, %v1364_v27, %v3412_v45 }
 0x363   : > { %4095 = vst [vmem:[#allocation33_spill] sm:$0xff] %v3449_v34 }
 0x366   : > { %v3441_v22 = vpop.permute.xlu0 %1319 }
 0x367   : > { %v1336_v20 = vpop.permute.xlu1 %1335  ;;  %v1324_v35 = vsel %vm609_vm1, %v3441_v22, %v1314_v28  ;;  %v4098_v28 = vperm.slane %v2680_v8, 1 }
 0x368   : > { %v1340_v21 = vsel %vm630_vm2, %v1336_v20, %v1330_v52  ;;  %v3468_v26 = vmul.f32 %v1324_v35, %v4096_v39  ;;  %v1403_v52 = vmul.f32 %v1400_v49, %v3306_v30  ;;  %v3485_v35 = vmul.f32 %v1355_v12, %v4099_v43 }
 0x369   : > { %v3476_v36 = vmul.f32 %v1340_v21, %v4098_v28  ;;  %v1599_v21 = vmul.f32 %v3389_v0, %v3410_v29  ;;  %v4100_v28 = vperm.slane %v2776_v16, 0  ;;  %v1356_v49 = vsel %vm651_vm3, %v3395_v60, %v1346_v6 }
 0x36a   : > { %v1530_v39 = vmul.f32 %v3385_v42, %v3468_v26  ;;  %v1455_v43 = vmul.f32 %v3344_v11, %v3403_v56  ;;  %v1591_v6 = vmul.f32 %v3369_v51, %v3403_v56  ;;  %v3522_v3 = vmul.f32 %v1356_v49, %v4101_v9 }
 0x36b   : > { %v3495_v34 = vmul.f32 %v1322_v14, %v4100_v28  ;;  %v1538_v12 = vmul.f32 %v3375_v57, %v3476_v36  ;;  %v1383_v14 = vmul.f32 %v3350_v5, %v3403_v56  ;;  %v1562_v27 = vmul.f32 %v3381_v63, %v3485_v35  ;;  %v3526_v57 = vpop.permute.xlu2 %1571 }
 0x36c   : > { %v1467_v58 = vadd.f32 %v1463_v23, %v1455_v43  ;;  %4102 = vst [vmem:[#allocation35_spill] sm:$0xff] %v3526_v57  ;;  %v4103_v23 = vperm.slane %v2669_v59, 4  ;;  %v4104_v43 = vperm.slane %v2680_v8, 4 }
 0x36d   : > { %v1542_v28 = vadd.f32 %v1538_v12, %v1530_v39  ;;  %v1395_v54 = vadd.f32 %v1391_v24, %v1383_v14  ;;  %v1603_v39 = vadd.f32 %v1599_v21, %v1591_v6  ;;  %v3541_v49 = vmul.f32 %v3385_v42, %v3495_v34 }
 0x36e   : > { %v1334_v32 = vpop.permute.xlu0 %1333  ;;  %v3530_v12 = vmul.f32 %v1370_v7, %v4103_v23  ;;  %v3534_v40 = vmul.f32 %v1371_v31, %v4104_v43  ;;  %v4106_v7 = vperm.slane %v2776_v16, 1  ;;  %v1384_v8 = vmul.f32 %v3350_v5, %v3495_v34 }
 0x36f   : > { %v1554_v44 = vadd.f32 %v1550_v25, %v1542_v28  ;;  %v1350_v13 = vpop.permute.xlu1 %1349  ;;  %v1338_v9 = vsel %vm630_vm2, %v3383_v33, %v1334_v32  ;;  %4105 = vst [vmem:[#allocation36_spill] sm:$0xff] %v3541_v49  ;;  %v4107_v33 = vperm.slane %v2669_v59, 3  ;;  %v1479_v6 = vadd.f32 %v1475_v2, %v1467_v58 }
 0x370   : > { %v1354_v24 = vsel %vm651_vm3, %v3399_v48, %v1350_v13  ;;  %v3548_v21 = vmul.f32 %v1338_v9, %v4106_v7  ;;  %v1574_v31 = vmul.f32 %v3526_v57, %v3534_v40  ;;  %v1407_v28 = vadd.f32 %v1403_v52, %v1395_v54 }
 0x371   : > { %v1566_v25 = vadd.f32 %v1562_v27, %v1554_v44  ;;  %v3556_v14 = vmul.f32 %v1354_v24, %v4107_v33  ;;  %v1615_v23 = vadd.f32 %v1611_v62, %v1603_v39  ;;  %v1382_v48 = vmul.f32 %v3350_v5, %v3468_v26 }
 0x372   : > { %v1390_v43 = vmul.f32 %v3326_v18, %v3476_v36  ;;  %v1499_v27 = vmul.f32 %v3371_v15, %v3530_v12  ;;  %v1353_v54 = vsel %vm651_vm3, %v1350_v13, %v3395_v60  ;;  %v1427_v62 = vmul.f32 %v3334_v46, %v3530_v12 }
 0x373   : > { %v3562_v9 = vadd.f32 %v1574_v31, %v1566_v25  ;;  %v1487_v44 = vmul.f32 %v3356_v10, %v3556_v14  ;;  %v1415_v59 = vmul.f32 %v3358_v61, %v3556_v14  ;;  %v1623_v58 = vmul.f32 %v3377_v41, %v3556_v14 }
 0x374   : > { %v1392_v2 = vmul.f32 %v3326_v18, %v3548_v21  ;;  %v1321_v52 = vsel %vm609_vm1, %v3393_v47, %v3441_v22  ;;  %v1337_v39 = vsel %vm630_vm2, %v1334_v32, %v1336_v20  ;;  %v1394_v25 = vadd.f32 %v1390_v43, %v1382_v48 }
 0x375   : > { %4108 = vst [vmem:[#allocation37_spill] sm:$0xff] %v3562_v9  ;;  %v1491_v24 = vadd.f32 %v1487_v44, %v1479_v6  ;;  %v1419_v7 = vadd.f32 %v1415_v59, %v1407_v28  ;;  %v1590_v31 = vmul.f32 %v3369_v51, %v3468_v26  ;;  %v1598_v33 = vmul.f32 %v3389_v0, %v3476_v36 }
 0x376   : > { %v1368_v13 = vpop.permute.xlu0 %1367  ;;  %v1396_v60 = vadd.f32 %v1392_v2, %v1384_v8  ;;  %v4109_v9 = vperm.slane %v2776_v16, 3  ;;  %v4110_v22 = vperm.slane %v2789_v17, 1  ;;  %v4111_v28 = vperm.slane %v2776_v16, 4 }
 0x377   : > { %v3593_v57 = vpop.permute.xlu1 %1631  ;;  %v1369_v32 = vsel %vm672_vm4, %v3412_v45, %v1368_v13  ;;  %v1503_v20 = vadd.f32 %v1499_v27, %v1491_v24  ;;  %v1431_v47 = vadd.f32 %v1427_v62, %v1419_v7  ;;  %v1627_v43 = vadd.f32 %v1623_v58, %v1615_v23 }
 0x378   : > { %v3591_v49 = vmul.f32 %v1353_v54, %v4109_v9  ;;  %v3600_v8 = vmul.f32 %v1337_v39, %v4110_v22  ;;  %v1635_v6 = vmul.f32 %v3593_v57, %v3530_v12  ;;  %v3606_v48 = vmul.f32 %v1369_v32, %v4111_v28 }
 0x379   : > { %1508 = vrot.lane.b32.xlu0 %v1503_v20, %s2300_s29  ;;  %1436 = vrot.lane.b32.xlu2 %v1431_v47, %s2301_s23  ;;  %v1667_v45 = vmul.f32 %v3373_v4, %v3403_v56  ;;  %v3614_v9 = vmul.f32 %v3373_v4, %v3495_v34  ;;  %v1408_v44 = vadd.f32 %v3430_v53, %v1396_v60  ;;  %v4112_v27 = vperm.slane %v2789_v17, 0 }
 0x37a   : > { %v1639_v16 = vadd.f32 %v1635_v6, %v1627_v43  ;;  %v1406_v23 = vadd.f32 %v3459_v37, %v1394_v25  ;;  %v1417_v54 = vmul.f32 %v3358_v61, %v3522_v3  ;;  %v1675_v62 = vmul.f32 %v3391_v38, %v3410_v29  ;;  %v4113_v43 = vld [vmem:[#allocation34_spill] sm:$0xff] }
 0x37b   : > { %v3619_v59 = vmul.f32 %v1321_v52, %v4112_v27  ;;  %v1416_v56 = vmul.f32 %v3358_v61, %v3591_v49  ;;  %v1428_v58 = vmul.f32 %v3334_v46, %v3606_v48  ;;  %v1414_v53 = vmul.f32 %v3358_v61, %v3485_v35 }
 0x37c   : > { %1644 = vrot.lane.b32.xlu1 %v1639_v16, %s2302_s30  ;;  %v1602_v2 = vadd.f32 %v1598_v33, %v1590_v31  ;;  %v1393_v37 = vmul.f32 %v3326_v18, %v3600_v8  ;;  %v1454_v52 = vmul.f32 %v3344_v11, %v3468_v26  ;;  %v1462_v29 = vmul.f32 %v3379_v1, %v3476_v36 }
 0x37d   : > { %v1420_v39 = vadd.f32 %v1416_v56, %v1408_v44  ;;  %v3641_v24 = vmul.f32 %v3377_v41, %v3522_v3  ;;  %v1456_v61 = vmul.f32 %v3344_v11, %v3495_v34  ;;  %v3647_v7 = vmul.f32 %v3381_v63, %v3522_v3 }
 0x37e   : > { %v3649_v60 = vpop.permute.xlu0 %1683  ;;  %v1418_v18 = vadd.f32 %v1414_v53, %v1406_v23  ;;  %v1622_v25 = vmul.f32 %v3377_v41, %v3485_v35  ;;  %v1385_v31 = vmul.f32 %v3350_v5, %v3619_v59  ;;  %v1486_v33 = vmul.f32 %v3356_v10, %v3485_v35  ;;  %v4114_v23 = vld [vmem:[#allocation28_spill] sm:$0xff] }
 0x37f   : > { %v1372_v32 = vsel %vm672_vm4, %v1368_v13, %v3419_v50  ;;  %v1679_v20 = vadd.f32 %v1675_v62, %v1667_v45  ;;  %v1687_v47 = vmul.f32 %v3649_v60, %v3306_v30  ;;  %v1432_v22 = vadd.f32 %v1428_v58, %v1420_v39 }
 0x380   : > { %v3662_v6 = vpop.permute.xlu1 %1707  ;;  %v1426_v28 = vmul.f32 %v3334_v46, %v3534_v40  ;;  %v1614_v44 = vadd.f32 %v4113_v43, %v1602_v2  ;;  %v1397_v5 = vadd.f32 %v1393_v37, %v1385_v31  ;;  %v1466_v27 = vadd.f32 %v1462_v29, %v1454_v52  ;;  %v4116_v2 = vld [vmem:[#allocation24_spill] sm:$0xff] }
 0x381   : > { %v1691_v16 = vadd.f32 %v1687_v47, %v1679_v20  ;;  %1438 = vrot.lane.b32.xlu0 %v1432_v22, %s2301_s23  ;;  %v1699_v50 = vmul.f32 %v4114_v23, %v3556_v14  ;;  %v1498_v13 = vmul.f32 %v3371_v15, %v3534_v40  ;;  %v1601_v30 = vmul.f32 %v3389_v0, %v3600_v8  ;;  %v4118_v22 = vld [vmem:[#allocation35_spill] sm:$0xff] }
 0x382   : > { %v1634_v45 = vmul.f32 %v3593_v57, %v3534_v40  ;;  %v4115_v62 = vperm.slane %v2789_v17, 4  ;;  %v1430_v58 = vadd.f32 %v1426_v28, %v1418_v18  ;;  %v1593_v53 = vmul.f32 %v3369_v51, %v3619_v59  ;;  %v4117_v17 = vld [vmem:[#allocation30_spill] sm:$0xff] }
 0x383   : > { %v1540_v37 = vmul.f32 %v4116_v2, %v3548_v21  ;;  %v1541_v52 = vmul.f32 %v4116_v2, %v3600_v8  ;;  %v1711_v29 = vmul.f32 %v3662_v6, %v3530_v12  ;;  %v1703_v39 = vadd.f32 %v1699_v50, %v1691_v16  ;;  %v4121_v2 = vld [vmem:[#allocation26_spill] sm:$0xff] }
 0x384   : > { %v3678_v56 = vmul.f32 %v1372_v32, %v4115_v62  ;;  %1434 = vrot.lane.b32.xlu1 %v1430_v58, %s2301_s23  ;;  %v1626_v31 = vadd.f32 %v1622_v25, %v1614_v44  ;;  %v1409_v32 = vadd.f32 %v4117_v17, %v1397_v5  ;;  %v1478_v18 = vadd.f32 %v3518_v19, %v1466_v27  ;;  %v4119_v5 = vld [vmem:[#allocation36_spill] sm:$0xff] }
 0x385   : > { %v1464_v20 = vmul.f32 %v3379_v1, %v3548_v21  ;;  %v1533_v47 = vmul.f32 %v3385_v42, %v3619_v59  ;;  %v1575_v28 = vmul.f32 %v4118_v22, %v3530_v12  ;;  %v1715_v43 = vadd.f32 %v1711_v29, %v1703_v39  ;;  %v4122_v39 = vld [vmem:[#allocation27_spill] sm:$0xff] }
 0x386   : > { %v1605_v62 = vadd.f32 %v1601_v30, %v1593_v53  ;;  %v1676_v16 = vmul.f32 %v3391_v38, %v3548_v21  ;;  %v1638_v50 = vadd.f32 %v1634_v45, %v1626_v31  ;;  %v1429_v25 = vmul.f32 %v3334_v46, %v3678_v56 }
 0x387   : > { %v1457_v19 = vmul.f32 %v3344_v11, %v3619_v59  ;;  %1720 = vrot.lane.b32.xlu2 %v1715_v43, %s2303_s16  ;;  %v1637_v42 = vmul.f32 %v3593_v57, %v3678_v56  ;;  %v1465_v12 = vmul.f32 %v3379_v1, %v3600_v8  ;;  %v1563_v44 = vmul.f32 %v3381_v63, %v3556_v14  ;;  %v4120_v11 = vld [vmem:[#allocation22_spill] sm:$0xff]  ;;  %v4123_v43 = vld [vmem:[#allocation31_spill] sm:$0xff] }
 0x388   : > { %v1544_v27 = vadd.f32 %v1540_v37, %v4119_v5  ;;  %v1421_v30 = vadd.f32 %v1417_v54, %v1409_v32  ;;  %v1490_v45 = vadd.f32 %v1486_v33, %v1478_v18  ;;  %v1468_v58 = vadd.f32 %v1464_v20, %v1456_v61  ;;  %v4124_v33 = vld [vmem:[#allocation21_spill] sm:$0xff] }
 0x389   : > { %v1545_v46 = vadd.f32 %v1541_v52, %v1533_v47  ;;  %1642 = vrot.lane.b32.xlu0 %v1638_v50, %s2302_s30  ;;  %v1617_v53 = vadd.f32 %v4120_v11, %v1605_v62  ;;  %v1567_v29 = vadd.f32 %v1563_v44, %v4121_v2  ;;  %v1564_v1 = vmul.f32 %v3381_v63, %v3591_v49  ;;  %v4125_v47 = vld [vmem:[#allocation32_spill] sm:$0xff] }
 0x38a   : > { %v1556_v31 = vadd.f32 %v4122_v39, %v1544_v27  ;;  %v1433_v17 = vadd.f32 %v1429_v25, %v1421_v30  ;;  %v1576_v54 = vmul.f32 %v4118_v22, %v3606_v48  ;;  %v1577_v61 = vmul.f32 %v4118_v22, %v3678_v56 }
 0x38b   : > { %v1557_v14 = vadd.f32 %v4123_v43, %v1545_v46  ;;  %v1688_v37 = vmul.f32 %v3649_v60, %v4124_v33  ;;  %v1469_v52 = vadd.f32 %v1465_v12, %v1457_v19  ;;  %v3724_v32 = vadd.f32 %v1575_v28, %v1567_v29  ;;  %v4126_v12 = vld [vmem:[#allocation19_spill] sm:$0xff] }
 0x38c   : > { %v1568_v18 = vadd.f32 %v1564_v1, %v1556_v31  ;;  %v1674_v20 = vmul.f32 %v3391_v38, %v3476_v36  ;;  %v1666_v63 = vmul.f32 %v3373_v4, %v3468_v26  ;;  %1440 = vrot.lane.b32.xlu1 %v1433_v17, %s2301_s23  ;;  %v1480_v62 = vadd.f32 %v4125_v47, %v1468_v58  ;;  %v4129_v1 = vld [vmem:[#allocation20_spill] sm:$0xff] }
 0x38d   : > { %v1569_v50 = vadd.f32 %v3647_v7, %v1557_v14  ;;  %v1680_v22 = vadd.f32 %v1676_v16, %v3614_v9  ;;  %v1502_v25 = vadd.f32 %v1498_v13, %v1490_v45  ;;  %v1629_v19 = vadd.f32 %v3641_v24, %v1617_v53  ;;  %v4127_v7 = vld [vmem:[#allocation33_spill] sm:$0xff] }
 0x38e   : > { %v3735_v28 = vadd.f32 %v1576_v54, %v1568_v18  ;;  %v1686_v44 = vmul.f32 %v3649_v60, %v4126_v12  ;;  %v1488_v36 = vmul.f32 %v3356_v10, %v3591_v49  ;;  %v1500_v26 = vmul.f32 %v3371_v15, %v3606_v48 }
 0x38f   : > { %v3743_v5 = vadd.f32 %v1577_v61, %v1569_v50  ;;  %v1692_v27 = vadd.f32 %v1688_v37, %v1680_v22  ;;  %1506 = vrot.lane.b32.xlu2 %v1502_v25, %s2300_s29  ;;  %v1641_v9 = vadd.f32 %v1637_v42, %v1629_v19  ;;  %v1481_v13 = vadd.f32 %v4127_v7, %v1469_v52  ;;  %v4130_v22 = vld [vmem:[#allocation18_spill] sm:$0xff]  ;;  %v4133_v7 = vld [vmem:[#allocation17_spill] sm:$0xff] }
 0x390   : > { %v1600_v24 = vmul.f32 %v3389_v0, %v3548_v21  ;;  %v1678_v16 = vadd.f32 %v1674_v20, %v1666_v63  ;;  %v1492_v30 = vadd.f32 %v1488_v36, %v1480_v62  ;;  %v1489_v45 = vmul.f32 %v3356_v10, %v3522_v3 }
 0x391   : > { %1648 = vrot.lane.b32.xlu0 %v1641_v9, %s2302_s30  ;;  %v1501_v58 = vmul.f32 %v3371_v15, %v3678_v56  ;;  %v1700_v46 = vmul.f32 %v4114_v23, %v3591_v49  ;;  %v1592_v42 = vmul.f32 %v3369_v51, %v3495_v34  ;;  %v1698_v29 = vmul.f32 %v4114_v23, %v3485_v35  ;;  %v4128_v15 = vld [vmem:[#allocation23_spill] sm:$0xff] }
 0x392   : > { %v1690_v11 = vadd.f32 %v1686_v44, %v1678_v16  ;;  %v1504_v53 = vadd.f32 %v1500_v26, %v1492_v30  ;;  %v1493_v2 = vadd.f32 %v1489_v45, %v1481_v13  ;;  %v1677_v10 = vmul.f32 %v3391_v38, %v3600_v8 }
 0x393   : > { %v1704_v0 = vadd.f32 %v1700_v46, %v1692_v27  ;;  %v1604_v21 = vadd.f32 %v1600_v24, %v1592_v42  ;;  %v1612_v39 = vmul.f32 %v4128_v15, %v4124_v33  ;;  %v1712_v31 = vmul.f32 %v3662_v6, %v3606_v48 }
 0x394   : > { %1510 = vrot.lane.b32.xlu1 %v1504_v53, %s2300_s29  ;;  %v1505_v51 = vadd.f32 %v1501_v58, %v1493_v2  ;;  %v1669_v34 = vmul.f32 %v3373_v4, %v3619_v59  ;;  %v1689_v17 = vmul.f32 %v3649_v60, %v4129_v1  ;;  %v1702_v43 = vadd.f32 %v1698_v29, %v1690_v11 }
 0x395   : > { %v1716_v35 = vadd.f32 %v1712_v31, %v1704_v0  ;;  %v1616_v38 = vadd.f32 %v1612_v39, %v1604_v21  ;;  %v1710_v14 = vmul.f32 %v3662_v6, %v3534_v40  ;;  %v1624_v54 = vmul.f32 %v3377_v41, %v3591_v49 }
 0x396   : > { %v1681_v8 = vadd.f32 %v1677_v10, %v1669_v34  ;;  %v1636_v4 = vmul.f32 %v3593_v57, %v3606_v48  ;;  %v1701_v33 = vmul.f32 %v4114_v23, %v3522_v3  ;;  %v1713_v40 = vmul.f32 %v3662_v6, %v3678_v56  ;;  %v1738_v57 = vld [vmem:[%s3908_s8] sm:$0xff] }
 0x397   : > { %1512 = vrot.lane.b32.xlu2 %v1505_v51, %s2300_s29  ;;  %v1714_v61 = vadd.f32 %v1710_v14, %v1702_v43  ;;  %v1628_v60 = vadd.f32 %v1624_v54, %v1616_v38  ;;  %v4131_v25 = vperm.slane %v4130_v22, 0  ;;  %v4132_v44 = vperm.slane %v4130_v22, 1  ;;  %v4140_v51 = vld [vmem:[#allocation25_spill] sm:$0xff]  ;;  %s4159_s29 = sld [smem:[#allocation40_spill]] }
 0x398   : > { %v1693_v59 = vadd.f32 %v1689_v17, %v1681_v8  ;;  %v4134_v13 = vperm.slane %v4133_v7, 0  ;;  %v4135_v30 = vperm.slane %v4133_v7, 1  ;;  %vm4136_vm1 = vcmp.lt.s32.totalorder %v2663_v55, 127  ;;  %v4142_v17 = vld [vmem:[#allocation29_spill] sm:$0xff] }
 0x399   : > { %1722 = vrot.lane.b32.xlu0 %v1716_v35, %s2303_s16  ;;  %v1640_v37 = vadd.f32 %v1636_v4, %v1628_v60  ;;  %v4137_v53 = vperm.slane %v4130_v22, 3  ;;  %vm4138_vm2 = vmmov %vm4136_vm1  ;;  %v4141_v34 = vperm.slane %v4140_v51, 1  ;;  %v4143_v43 = vperm.slane %v4142_v17, 1 }
 0x39a   : > { %v1705_v52 = vadd.f32 %v1701_v33, %v1693_v59  ;;  %vm4144_vm3 = vcmp.lt.s32.totalorder %v2663_v55, 126  ;;  %v4145_v14 = vperm.slane %v4130_v22, 4  ;;  %v4146_v4 = vperm.slane %v4140_v51, 0 }
 0x39b   : > { %v4148_v33 = vperm.slane %v4142_v17, 0  ;;  %vm4149_vm4 = vmmov %vm4144_vm3 }
 0x39c   : > { %1718 = vrot.lane.b32.xlu1 %v1714_v61, %s2303_s16  ;;  %v1717_v18 = vadd.f32 %v1713_v40, %v1705_v52  ;;  %v4147_v61 = vperm.slane %v4133_v7, 3  ;;  %vm4155_vm7 = vmmov %vm4144_vm3 }
 0x39d   : > { %vm4156_vm8 = vmmov %vm4144_vm3  ;;  %s1776_s23 = scalar_lea.hbm %s4159_s29, %s1903_s14  ;;  %s2214_s11 = scalar_lea.hbm %s4159_s29, 128 }
 0x39e   : > { %s1779_s12 = sshll.u32 %s1776_s23, 4  ;;  %s1780_s12 = int_to_ptr.hbm [resolvable:$true] %s1779_s12 }
 0x39f   : > { %1646 = vrot.lane.b32.xlu2 %v1640_v37, %s2302_s30  ;;  %s1777_s30 = sshll.u32 %s3300_s28, 4  ;;  %s2208_s15 = sshra.s32 %s1780_s12, 4  ;;  %s1778_s30 = int_to_ptr.vmem [resolvable:$true] %s1777_s30  ;;  %s2209_s15 = int_to_ptr.hbm [resolvable:$true] %s2208_s15 }
 0x3a0   : > { %s2210_s27 = scalar_lea.hbm %s2209_s15, 64  ;;  %p2215_p0 = scmp.lt.s32.totalorder %s2209_s15, %s4159_s29 }
 0x3a1   : > { %p2211_p4 = scmp.ne.s32.totalorder %s2209_s15, %s2210_s27  ;;  %p2216_p7 = scmp.lt.s32.totalorder %s2214_s11, %s2210_s27 }
 0x3a3   : > { %p2212_p6 = pnand %p2211_p4, %p2419_p11  ;;  %p2217_p5 = por %p2216_p7, %p2215_p0 }
 0x3a4   : > { %1724 = vrot.lane.b32.xlu1 %v1717_v18, %s2303_s16 }
 0x3a5   : > { %p2213_p13 = pneg %p2212_p6 }
 0x3a7   : > { %1741 = vperm.xlu2 %2062, %v1738_v57   ;;  %p2218_p8 = pnand %p2217_p5, %p2213_p13 }
 0x3d3   : > { %v1437_v41 = vpop.permute.xlu2 %1436 }
 0x3e1   : > { %v1721_v49 = vpop.permute.xlu2 %1720 }
 0x3e9   : > { %v1507_v23 = vpop.permute.xlu2 %1506 }
 0x3eb   : > { %v1509_v3 = vpop.permute.xlu0 %1508 }
 0x3ec   : > { %v1516_v50 = vsel %vm827_vm5, %v1507_v23, %v1509_v3 }
 0x3ed   : > { %v1519_v36 = vmul.f32 %v1516_v50, %v4132_v44  ;;  %v2100_v50 = vld [vmem:[%s2473_s22 + $0x28] sm:$0xff] }
 0x3ee   : > { %v1645_v48 = vpop.permute.xlu1 %1644 }
 0x3f1   : > { %v1513_v47 = vpop.permute.xlu2 %1512 }
 0x3f2   : > { %v1517_v26 = vsel %vm827_vm5, %v1513_v47, %v1507_v23  ;;  %v4150_v23 = vperm.slane %v4133_v7, 4 }
 0x3f3   : > { %v1439_v20 = vpop.permute.xlu0 %1438  ;;  %v1518_v45 = vmul.f32 %v1517_v26, %v4135_v30  ;;  %v4158_v30 = vperm.slane %v4142_v17, 4 }
 0x3f4   : > { %v1443_v29 = vsel %vm750_vm6, %v1437_v41, %v1439_v20 }
 0x3f5   : > { %v1448_v59 = vmul.f32 %v1443_v29, %v4146_v4 }
 0x3f6   : > { %v1435_v63 = vpop.permute.xlu1 %1434 }
 0x3f7   : > { %v1444_v6 = vsel %vm750_vm6, %v1435_v63, %v1437_v41 }
 0x3f8   : > { %v1447_v19 = vmul.f32 %v1444_v6, %v4131_v25 }
 0x3f9   : > { %v1647_v27 = vpop.permute.xlu2 %1646 }
 0x3fa   : > { %v1523_v16 = vadd.f32 %v1519_v36, %v1447_v19  ;;  %v1651_v58 = vsel %vm4136_vm1, %v1645_v48, %v1647_v27  ;;  %v4154_v36 = vperm.slane %v4142_v17, 3 }
 0x3fb   : > { %v1643_v62 = vpop.permute.xlu0 %1642  ;;  %v1655_v2 = vmul.f32 %v1651_v58, %v4137_v53 }
 0x3fc   : > { %v1583_v11 = vadd.f32 %v3724_v32, %v1523_v16  ;;  %v1652_v10 = vsel %vm4138_vm2, %v1643_v62, %v1645_v48  ;;  %v4139_v32 = vld [vmem:[#allocation37_spill] sm:$0xff] }
 0x3fd   : > { %v1654_v60 = vmul.f32 %v1652_v10, %v4147_v61 }
 0x3fe   : > { %v1441_v56 = vpop.permute.xlu1 %1440  ;;  %v1659_v8 = vadd.f32 %v1655_v2, %v1583_v11  ;;  %v2102_v11 = vld [vmem:[%s2473_s22 + $0x30] sm:$0xff]  ;;  %v2103_v2 = vld [vmem:[%s2473_s22 + $0x38] sm:$0xff] }
 0x3ff   : > { %v1445_v12 = vsel %vm750_vm6, %v1441_v56, %v1435_v63  ;;  %v1442_v15 = vsel %vm750_vm6, %v1439_v20, %v1441_v56  ;;  %vm4152_vm6 = vmmov %vm4136_vm1 }
 0x400   : > { %v1446_v24 = vmul.f32 %v1445_v12, %v4134_v13  ;;  %v1449_v37 = vmul.f32 %v1442_v15, %v4148_v33  ;;  %v4153_v12 = vperm.slane %v4140_v51, 3 }
 0x401   : > { %v1742_v40 = vpop.permute.xlu2 %1741 }
 0x402   : > { %v1522_v42 = vadd.f32 %v1518_v45, %v1446_v24  ;;  %v4157_v24 = vperm.slane %v4140_v51, 4 }
 0x403   : > { %v1649_v9 = vpop.permute.xlu0 %1648 }
 0x404   : > { %v1582_v31 = vadd.f32 %v4139_v32, %v1522_v42  ;;  %v1653_v56 = vsel %vm4152_vm6, %v1649_v9, %v1643_v62 }
 0x405   : > { %v1657_v26 = vmul.f32 %v1653_v56, %v4154_v36 }
 0x406   : > { %v1511_v46 = vpop.permute.xlu1 %1510  ;;  %v1658_v48 = vadd.f32 %v1654_v60, %v1582_v31 }
 0x407   : > { %v1514_v0 = vsel %vm827_vm5, %v1511_v46, %v1513_v47  ;;  %v1515_v21 = vsel %vm827_vm5, %v1509_v3, %v1511_v46  ;;  %vm4151_vm5 = vmmov %vm4136_vm1 }
 0x408   : > { %v1520_v1 = vmul.f32 %v1515_v21, %v4141_v34  ;;  %v1521_v35 = vmul.f32 %v1514_v0, %v4143_v43  ;;  %v1650_v6 = vsel %vm4151_vm5, %v1647_v27, %v1649_v9  ;;  %v2101_v27 = vld [vmem:[%s2473_s22 + $0x20] sm:$0xff] }
 0x409   : > { %v1656_v44 = vmul.f32 %v1650_v6, %v4153_v12 }
 0x40a   : > { %v1524_v41 = vadd.f32 %v1520_v1, %v1448_v59  ;;  %v1525_v3 = vadd.f32 %v1521_v35, %v1449_v37 }
 0x40b   : > { %v1723_v39 = vpop.permute.xlu0 %1722 }
 0x40c   : > { %v1727_v38 = vsel %vm4144_vm3, %v1721_v49, %v1723_v39  ;;  %v1585_v25 = vadd.f32 %v3743_v5, %v1525_v3 }
 0x40d   : > { %v1731_v54 = vmul.f32 %v1727_v38, %v4145_v14 }
 0x40e   : > { %v1719_v52 = vpop.permute.xlu1 %1718  ;;  %v1661_v9 = vadd.f32 %v1657_v26, %v1585_v25 }
 0x40f   : > { %v1735_v18 = vadd.f32 %v1731_v54, %v1659_v8  ;;  %v1728_v57 = vsel %vm4149_vm4, %v1719_v52, %v1721_v49  ;;  %v1584_v49 = vadd.f32 %v3735_v28, %v1524_v41 }
 0x410   : > { %v1730_v20 = vmul.f32 %v1728_v57, %v4150_v23 }
 0x411   : > { %v1745_v63 = vadd.f32 %v1742_v40, %v1735_v18  ;;  %v1660_v5 = vadd.f32 %v1656_v44, %v1584_v49 }
 0x412   : > { %v1734_v47 = vadd.f32 %v1730_v20, %v1658_v48 }
 0x413   : > { %v1757_v22 = vadd.f32 %v2100_v50, %v1745_v63 }
 0x414   : > { %v1744_v19 = vadd.f32 %v1742_v40, %v1734_v47 }
 0x415   : > { %1761 = vst [vmem:[%s3300_s28 + $0x28] sm:$0xff] %v1757_v22 }
 0x416   : > { %v1756_v7 = vadd.f32 %v2101_v27, %v1744_v19  ;;  %v1725_v13 = vpop.permute.xlu1 %1724 }
 0x417   : > { %v1726_v62 = vsel %vm4155_vm7, %v1723_v39, %v1725_v13  ;;  %v1729_v28 = vsel %vm4156_vm8, %v1725_v13, %v1719_v52 }
 0x418   : > { %1760 = vst [vmem:[%s3300_s28 + $0x20] sm:$0xff] %v1756_v7  ;;  %v1732_v16 = vmul.f32 %v1726_v62, %v4157_v24  ;;  %v1733_v45 = vmul.f32 %v1729_v28, %v4158_v30 }
 0x41a   : > { %v1736_v55 = vadd.f32 %v1732_v16, %v1660_v5  ;;  %v1737_v58 = vadd.f32 %v1733_v45, %v1661_v9 }
 0x41c   : > { %v1746_v46 = vadd.f32 %v1742_v40, %v1736_v55  ;;  %v1747_v42 = vadd.f32 %v1742_v40, %v1737_v58 }
 0x41e   : > { %v1758_v53 = vadd.f32 %v2102_v11, %v1746_v46  ;;  %v1759_v0 = vadd.f32 %v2103_v2, %v1747_v42 }
 0x420   : > { %1762 = vst [vmem:[%s3300_s28 + $0x30] sm:$0xff] %v1758_v53 }
 0x421   : > { %1763 = vst [vmem:[%s3300_s28 + $0x38] sm:$0xff] %v1759_v0 }
 0x422   : > { %2221 = shalt.err (!%p2218_p8)
}
 0x423   : > { %s2305_s24 = smov 512   ;;  %s2306_s22 = smov 1024  }
 0x424   : > { %1914 = dma.vmem_to_hbm [thread:$0]  (%p2419_p11), %s1778_s30, 1024, %s1780_s12, %s1765_s13, %s2305_s24, %s2306_s22, %s2292_s26  }
 0x425 PF: > { %s4161_s28 = sld [smem:[#allocation12_spill]]  ;;  %p4163_p9 = scmp.ge.s32.totalorder %s2264_s20, 2 }
 0x427   : > { %p1928_p10 = pnand %p4163_p9, %p2423_p12 }
 0x429   : > { %p1929_p1 = pneg %p1928_p10 }
 0x42b   : > { %s1794_s17 = sand.u32 1, %s4161_s28  }
 0x42c   : > { %s1795_s23 = scalar_lea.sflag [#allocation4], %s1794_s17 }
 0x42d   : > { %2247 = dma.done.wait (%p1929_p1), %s1795_s23, 1024  }
 0x42e   : > { %2249 = vsyncadd (%p1929_p1), %s1795_s23, 4294966272  ;;  %s4164_s20 = sld [smem:[#allocation13_spill]]  ;;  %s4166_s17 = smov %s2256_s18 }
 0x42f   : > { %s4165_s15 = sld [smem:[#allocation14_spill]]  ;;  %s4167_s18 = smov %s2260_s19 }
 0x434   : > { %p25_p2 = scmp.ge.s32.totalorder %s4164_s20, 4  }
 0x435   : > { %s4168_s19 = smov %s4165_s15 }
 0x436   :  { %27 = sbr.rel (!%p25_p2) target bundleno = 10 (0xa), region = 117 }
 0x43b   :  { %1801 = vsyncpa [#allocation3], 1 }
 0x43c   :  { %1803 = vsyncpa [#allocation3 + $0x1], 1 }
 0x43d   :  { %1804 = vsyncpa [#allocation6], 1 }
 0x43e   :  { %1805 = vsyncpa [#allocation4], 1 }
 0x43f   :  { %1807 = vsyncpa [#allocation4 + $0x1], 1 }

</bundles_post_ra>
